<compile_context>
chip_gen: v6e
topology: v6e:2x2x1
jax: 0.10.0
libtpu: 0.0.40
codegen_flags: <defaults>
</compile_context>

<pallas_src>
import jax
import jax.numpy as jnp
from jax.experimental import pallas as pl
from jax.experimental.pallas import tpu as pltpu

LANE = 128                     # padded output-channel width (lane-dense stores)
VMEM_LIMIT = 32 * 1024 * 1024  # safe scoped-VMEM cap on v5e/v6e/v7x


# ----------------------------- Pallas kernels -------------------------------

def _conv_pool_kernel(a_ref, w_ref, b_ref, o_ref):
    """Fused conv (as matmul) + bias + tanh + 2x2 max-pool for one image.

    a: (1, 4, P, K) bf16  -- 4 pool-quadrant patch blocks, P pooled pixels, K taps
    w: (K, 128)    bf16
    b: (1, 128)    f32
    o: (1, P, 128) bf16   -- pooled activation map, flat (h, w) row order
    """
    w = w_ref[...]
    b = b_ref[...]
    r = None
    for q in range(a_ref.shape[1]):                       # static unroll (4)
        h = jnp.dot(a_ref[0, q, :, :], w, preferred_element_type=jnp.float32)
        h = jnp.tanh(h + b)                               # tanh is monotone, so
        r = h if r is None else jnp.maximum(r, h)         # max-after-tanh == pool
    o_ref[0, :, :] = r.astype(o_ref.dtype)


def conv_pool(a, w, b, *, out_dtype=jnp.bfloat16):
    """Per-image grid over the fused conv+tanh+pool kernel."""
    n, nq, P, K = a.shape
    NP = w.shape[1]
    assert nq == 4 and NP % LANE == 0, (a.shape, w.shape)
    return pl.pallas_call(
        _conv_pool_kernel,
        out_shape=jax.ShapeDtypeStruct((n, P, NP), out_dtype),
        grid=(n,),
        in_specs=[
            pl.BlockSpec((1, nq, P, K), lambda i: (i, 0, 0, 0)),  # patches (per image)
            pl.BlockSpec((K, NP), lambda i: (0, 0)),              # weights (resident)
            pl.BlockSpec((1, NP), lambda i: (0, 0)),              # bias    (resident)
        ],
        out_specs=pl.BlockSpec((1, P, NP), lambda i: (i, 0, 0)),
        compiler_params=pltpu.CompilerParams(
            dimension_semantics=("parallel",),
            vmem_limit_bytes=VMEM_LIMIT),
    )(a, w, b)


def _tail_kernel(x_ref, w3_ref, b3_ref, w1_ref, b1_ref, w2_ref, b2_ref, o_ref):
    """conv3(as dense, K=400)+tanh -> fc1+tanh -> fc2; all weights VMEM-resident."""
    h = jnp.dot(x_ref[0], w3_ref[...], preferred_element_type=jnp.float32)
    h = jnp.tanh(h + b3_ref[...])
    h = jnp.dot(h.astype(jnp.bfloat16), w1_ref[...],
                preferred_element_type=jnp.float32)
    h = jnp.tanh(h + b1_ref[...])
    h = jnp.dot(h.astype(jnp.bfloat16), w2_ref[...],
                preferred_element_type=jnp.float32)
    o_ref[0] = (h + b2_ref[...]).astype(o_ref.dtype)


def tail_fused(x, w3, b3, w1, b1, w2, b2):
    n, _, K = x.shape
    NP = w3.shape[1]
    return pl.pallas_call(
        _tail_kernel,
        out_shape=jax.ShapeDtypeStruct((n, 1, NP), jnp.float32),
        grid=(n,),
        in_specs=[
            pl.BlockSpec((1, 1, K), lambda i: (i, 0, 0)),
            pl.BlockSpec((K, NP), lambda i: (0, 0)),
            pl.BlockSpec((1, NP), lambda i: (0, 0)),
            pl.BlockSpec((NP, NP), lambda i: (0, 0)),
            pl.BlockSpec((1, NP), lambda i: (0, 0)),
            pl.BlockSpec((NP, NP), lambda i: (0, 0)),
            pl.BlockSpec((1, NP), lambda i: (0, 0)),
        ],
        out_specs=pl.BlockSpec((1, 1, NP), lambda i: (i, 0, 0)),
        compiler_params=pltpu.CompilerParams(
            dimension_semantics=("parallel",),
            vmem_limit_bytes=VMEM_LIMIT),
    )(x.astype(jnp.bfloat16), w3, b3, w1, b1, w2, b2)


# ---------------------- patch building (XLA glue, jit-fused) -----------------

def _conv1_patches(xp):
    """xp: (n, 32, 32) bf16 (zero-padded 28x28) -> (n, 4, 196, 32) patches.

    Rows per image: quadrant q = hi*2+wi major, pooled pixel p = hp*14+wp minor,
    where output pixel (h, w) = (2*hp+hi, 2*wp+wi).  K = 25 taps padded to 32.
    """
    n = xp.shape[0]
    cols = [xp[:, i:i + 28, j:j + 28] for i in range(5) for j in range(5)]
    pat = jnp.stack(cols, axis=-1)                         # (n, 28, 28, 25)
    pat = pat.reshape(n, 14, 2, 14, 2, 25)                 # (n, hp, hi, wp, wi, k)
    pat = pat.transpose(0, 2, 4, 1, 3, 5)                  # (n, hi, wi, hp, wp, k)
    pat = pat.reshape(n, 4, 196, 25)
    return jnp.pad(pat, ((0, 0), (0, 0), (0, 0), (0, 32 - 25)))


def _conv2_patches(h):
    """h: (n, 14, 14, 8) bf16 (6 live + 2 zero channels) -> (n, 4, 25, 200)."""
    n = h.shape[0]
    cols = [h[:, i:i + 10, j:j + 10, :] for i in range(5) for j in range(5)]
    pat = jnp.stack(cols, axis=3)                          # (n, 10, 10, 25, 8)
    pat = pat.reshape(n, 10, 10, 200)                      # K order = (tap, c)
    pat = pat.reshape(n, 5, 2, 5, 2, 200)                  # (n, hp, hi, wp, wi, K)
    pat = pat.transpose(0, 2, 4, 1, 3, 5)                  # (n, hi, wi, hp, wp, K)
    return pat.reshape(n, 4, 25, 200)


# ------------------------------- parameters ----------------------------------

def init_params(key):
    """PyTorch-style uniform(-1/sqrt(fan_in), +1/sqrt(fan_in)) init, raw torch layouts."""
    ks = jax.random.split(key, 10)

    def u(k, shape, fan_in):
        bound = 1.0 / (fan_in ** 0.5)
        return jax.random.uniform(k, shape, jnp.float32, -bound, bound)

    return {
        "conv1_w": u(ks[0], (6, 1, 5, 5), 1 * 5 * 5),
        "conv1_b": u(ks[1], (6,), 1 * 5 * 5),
        "conv2_w": u(ks[2], (16, 6, 5, 5), 6 * 5 * 5),
        "conv2_b": u(ks[3], (16,), 6 * 5 * 5),
        "conv3_w": u(ks[4], (120, 16, 5, 5), 16 * 5 * 5),
        "conv3_b": u(ks[5], (120,), 16 * 5 * 5),
        "fc1_w": u(ks[6], (84, 120), 120),       # torch Linear: (out, in)
        "fc1_b": u(ks[7], (84,), 120),
        "fc2_w": u(ks[8], (10, 84), 84),
        "fc2_b": u(ks[9], (10,), 84),
    }


def prepare_params(raw):
    """One-time transpose / zero-pad / bf16-cast of raw params into kernel form."""
    def pad_bias(b):
        return jnp.pad(b, (0, LANE - b.shape[0])).astype(jnp.float32).reshape(1, LANE)

    def conv_w(w, cin_pad):                      # (OC,Cin,KH,KW) -> (KH*KW*cin_pad, 128)
        oc, cin, kh, kw = w.shape
        wt = jnp.transpose(w, (2, 3, 1, 0))      # (kh, kw, cin, oc)
        wt = jnp.pad(wt, ((0, 0), (0, 0), (0, cin_pad - cin), (0, LANE - oc)))
        return wt.reshape(kh * kw * cin_pad, LANE).astype(jnp.bfloat16)

    def fc_w(w):                                 # torch (out, in) -> (128, 128)
        o, i = w.shape
        return jnp.pad(w.T, ((0, LANE - i), (0, LANE - o))).astype(jnp.bfloat16)

    # conv1: Cin == 1, so K = 25; pad K to 32 to match the zero-padded patches.
    w1 = raw["conv1_w"].reshape(6, 25).T                       # (25, 6), rows = kh*5+kw
    w1 = jnp.pad(w1, ((0, 32 - 25), (0, LANE - 6))).astype(jnp.bfloat16)

    return {
        "conv1_w": w1,                         "conv1_b": pad_bias(raw["conv1_b"]),
        "conv2_w": conv_w(raw["conv2_w"], 8),  "conv2_b": pad_bias(raw["conv2_b"]),
        "conv3_w": conv_w(raw["conv3_w"], 16), "conv3_b": pad_bias(raw["conv3_b"]),
        "fc1_w": fc_w(raw["fc1_w"]),           "fc1_b": pad_bias(raw["fc1_b"]),
        "fc2_w": fc_w(raw["fc2_w"]),           "fc2_b": pad_bias(raw["fc2_b"]),
    }


# --------------------------------- forward -----------------------------------

@jax.jit
def lenet_forward(p, x):
    """x: (N, 1, 28, 28) f32 -> logits (N, 10) f32."""
    n = x.shape[0]
    # NCHW (C=1) -> (N, H, W), spatial zero-pad 2 for conv1, bf16 matmul operands.
    xh = x.reshape(n, 28, 28).astype(jnp.bfloat16)
    xh = jnp.pad(xh, ((0, 0), (2, 2), (2, 2)))              # (n, 32, 32)

    # conv1 (5x5, pad 2) + tanh + pool -> (n, 196, 128), channels 0..5 live.
    a1 = _conv1_patches(xh)                                  # (n, 4, 196, 32)
    h1 = conv_pool(a1, p["conv1_w"], p["conv1_b"])           # (n, 196, 128)

    # conv2 (5x5, Cin=6 live) + tanh + pool -> (n, 25, 128), channels 0..15 live.
    h1m = h1.reshape(n, 14, 14, LANE)[..., :8]               # live 6 + 2 zero channels
    a2 = _conv2_patches(h1m)                                 # (n, 4, 25, 200)
    h2 = conv_pool(a2, p["conv2_w"], p["conv2_b"])           # (n, 25, 128)

    # conv3 on a 5x5 input is dense (K = 5*5*16 = 400); fuse conv3+tanh+fc1+tanh+fc2.
    t_in = h2.reshape(n, 5, 5, LANE)[..., :16].reshape(n, 1, 400)
    out = tail_fused(t_in, p["conv3_w"], p["conv3_b"],
                     p["fc1_w"], p["fc1_b"], p["fc2_w"], p["fc2_b"])  # (n, 1, 128)
    return out.reshape(n, LANE)[:, :10]


# ---------------------------- plain-JAX reference -----------------------------

def reference_forward(raw, x):
    """f32 reference using lax conv/reduce_window (independent of kernel layout)."""
    def conv(h, w, b, pad):
        y = jax.lax.conv_general_dilated(
            h, w, window_strides=(1, 1),
            padding=[(pad, pad), (pad, pad)],
            dimension_numbers=("NCHW", "OIHW", "NCHW"))
        return jnp.tanh(y + b.reshape(1, -1, 1, 1))

    def pool(h):
        return jax.lax.reduce_window(h, -jnp.inf, jax.lax.max,
                                     (1, 1, 2, 2), (1, 1, 2, 2), "VALID")

    h = pool(conv(x, raw["conv1_w"], raw["conv1_b"], 2))
    h = pool(conv(h, raw["conv2_w"], raw["conv2_b"], 0))
    h = conv(h, raw["conv3_w"], raw["conv3_b"], 0).reshape(x.shape[0], 120)
    h = jnp.tanh(h @ raw["fc1_w"].T + raw["fc1_b"])
    return h @ raw["fc2_w"].T + raw["fc2_b"]


if __name__ == "__main__":
    key = jax.random.PRNGKey(0)
    pkey, xkey = jax.random.split(key)
    raw = init_params(pkey)
    params = prepare_params(raw)

    # LeNet expects 28x28 single-channel inputs; batch = 2.
    x = jax.random.normal(xkey, (2, 1, 28, 28), dtype=jnp.float32)

    out = jax.block_until_ready(lenet_forward(params, x))
    assert out.shape == (2, 10), out.shape
    assert out.dtype == jnp.float32

    # Loose sanity check vs a plain-JAX f32 reference (kernel path uses bf16).
    ref = reference_forward(raw, x)
    err = float(jnp.max(jnp.abs(out - ref)))
    assert err < 0.25, f"max |pallas - reference| too large: {err}"

    print("KERNEL_OK")
</pallas_src>

<mosaic_0001>
module attributes {stable_mosaic.version = 11 : i64} {
  func.func @_conv_pool_kernel(%arg0: i32, %arg1: memref<1x4x196x32xbf16, #tpu.memory_space<vmem>>, %arg2: memref<32x128xbf16, #tpu.memory_space<vmem>>, %arg3: memref<1x128xf32, #tpu.memory_space<vmem>>, %arg4: memref<1x196x128xbf16, #tpu.memory_space<vmem>>) attributes {dimension_semantics = [#tpu.dimension_semantics<parallel>], iteration_bounds = array<i64: 2>, scalar_prefetch = 0 : i64, scratch_operands = 0 : i64, tpu.core_type = #tpu.core_type<tc>, window_params = [{transform_indices = @transform_0, window_bounds = array<i64: 1, 4, 196, 32>}, {pipeline_mode = #tpu.pipeline_mode<synchronous>, transform_indices = @transform_1, window_bounds = array<i64: 32, 128>}, {pipeline_mode = #tpu.pipeline_mode<synchronous>, transform_indices = @transform_2, window_bounds = array<i64: 1, 128>}, {transform_indices = @transform_3, window_bounds = array<i64: 1, 196, 128>}]} {
    %c0 = arith.constant 0 : index
    %c0_0 = arith.constant 0 : index
    %0 = vector.load %arg2[%c0, %c0_0] : memref<32x128xbf16, #tpu.memory_space<vmem>>, vector<32x128xbf16>
    %c0_1 = arith.constant 0 : index
    %c0_2 = arith.constant 0 : index
    %1 = vector.load %arg3[%c0_1, %c0_2] : memref<1x128xf32, #tpu.memory_space<vmem>>, vector<1x128xf32>
    %c0_3 = arith.constant 0 : index
    %c0_4 = arith.constant 0 : index
    %c0_5 = arith.constant 0 : index
    %c0_6 = arith.constant 0 : index
    %2 = vector.load %arg1[%c0_3, %c0_4, %c0_5, %c0_6] : memref<1x4x196x32xbf16, #tpu.memory_space<vmem>>, vector<1x1x196x32xbf16>
    %3 = vector.shape_cast %2 : vector<1x1x196x32xbf16> to vector<196x32xbf16>
    %cst = arith.constant dense<0.000000e+00> : vector<196x128xf32>
    %4 = tpu.matmul %3, %0, %cst {dimension_numbers = #tpu.dot_dimension_numbers<[1], [0], [0], [1], [0, 0, 1, 1], [], []>} : vector<196x32xbf16>, vector<32x128xbf16>, vector<196x128xf32> -> vector<196x128xf32>
    %5 = vector.broadcast %1 : vector<1x128xf32> to vector<196x128xf32>
    %6 = arith.addf %4, %5 : vector<196x128xf32>
    %7 = math.tanh %6 : vector<196x128xf32>
    %c0_7 = arith.constant 0 : index
    %c1 = arith.constant 1 : index
    %c0_8 = arith.constant 0 : index
    %c0_9 = arith.constant 0 : index
    %8 = vector.load %arg1[%c0_7, %c1, %c0_8, %c0_9] : memref<1x4x196x32xbf16, #tpu.memory_space<vmem>>, vector<1x1x196x32xbf16>
    %9 = vector.shape_cast %8 : vector<1x1x196x32xbf16> to vector<196x32xbf16>
    %cst_10 = arith.constant dense<0.000000e+00> : vector<196x128xf32>
    %10 = tpu.matmul %9, %0, %cst_10 {dimension_numbers = #tpu.dot_dimension_numbers<[1], [0], [0], [1], [0, 0, 1, 1], [], []>} : vector<196x32xbf16>, vector<32x128xbf16>, vector<196x128xf32> -> vector<196x128xf32>
    %11 = vector.broadcast %1 : vector<1x128xf32> to vector<196x128xf32>
    %12 = arith.addf %10, %11 : vector<196x128xf32>
    %13 = math.tanh %12 : vector<196x128xf32>
    %14 = arith.maximumf %7, %13 : vector<196x128xf32>
    %c0_11 = arith.constant 0 : index
    %c2 = arith.constant 2 : index
    %c0_12 = arith.constant 0 : index
    %c0_13 = arith.constant 0 : index
    %15 = vector.load %arg1[%c0_11, %c2, %c0_12, %c0_13] : memref<1x4x196x32xbf16, #tpu.memory_space<vmem>>, vector<1x1x196x32xbf16>
    %16 = vector.shape_cast %15 : vector<1x1x196x32xbf16> to vector<196x32xbf16>
    %cst_14 = arith.constant dense<0.000000e+00> : vector<196x128xf32>
    %17 = tpu.matmul %16, %0, %cst_14 {dimension_numbers = #tpu.dot_dimension_numbers<[1], [0], [0], [1], [0, 0, 1, 1], [], []>} : vector<196x32xbf16>, vector<32x128xbf16>, vector<196x128xf32> -> vector<196x128xf32>
    %18 = vector.broadcast %1 : vector<1x128xf32> to vector<196x128xf32>
    %19 = arith.addf %17, %18 : vector<196x128xf32>
    %20 = math.tanh %19 : vector<196x128xf32>
    %21 = arith.maximumf %14, %20 : vector<196x128xf32>
    %c0_15 = arith.constant 0 : index
    %c3 = arith.constant 3 : index
    %c0_16 = arith.constant 0 : index
    %c0_17 = arith.constant 0 : index
    %22 = vector.load %arg1[%c0_15, %c3, %c0_16, %c0_17] : memref<1x4x196x32xbf16, #tpu.memory_space<vmem>>, vector<1x1x196x32xbf16>
    %23 = vector.shape_cast %22 : vector<1x1x196x32xbf16> to vector<196x32xbf16>
    %cst_18 = arith.constant dense<0.000000e+00> : vector<196x128xf32>
    %24 = tpu.matmul %23, %0, %cst_18 {dimension_numbers = #tpu.dot_dimension_numbers<[1], [0], [0], [1], [0, 0, 1, 1], [], []>} : vector<196x32xbf16>, vector<32x128xbf16>, vector<196x128xf32> -> vector<196x128xf32>
    %25 = vector.broadcast %1 : vector<1x128xf32> to vector<196x128xf32>
    %26 = arith.addf %24, %25 : vector<196x128xf32>
    %27 = math.tanh %26 : vector<196x128xf32>
    %28 = arith.maximumf %21, %27 : vector<196x128xf32>
    %29 = arith.truncf %28 : vector<196x128xf32> to vector<196x128xbf16>
    %c0_19 = arith.constant 0 : index
    %c0_20 = arith.constant 0 : index
    %c0_21 = arith.constant 0 : index
    %30 = vector.load %arg4[%c0_19, %c0_20, %c0_21] : memref<1x196x128xbf16, #tpu.memory_space<vmem>>, vector<1x196x128xbf16>
    %31 = vector.shape_cast %30 : vector<1x196x128xbf16> to vector<196x128xbf16>
    %32 = vector.shape_cast %29 : vector<196x128xbf16> to vector<1x196x128xbf16>
    tpu.vector_store %arg4[%c0_19, %c0_20, %c0_21], %32 {strides = array<i32>} : memref<1x196x128xbf16, #tpu.memory_space<vmem>>, vector<1x196x128xbf16>,
    return
  }
  func.func @transform_0(%arg0: i32) -> (i32, i32, i32, i32) {
    %c0_i32 = arith.constant 0 : i32
    %c0_i32_0 = arith.constant 0 : i32
    %c0_i32_1 = arith.constant 0 : i32
    %c0_i32_2 = arith.constant 0 : i32
    return %arg0, %c0_i32, %c0_i32_0, %c0_i32_1 : i32, i32, i32, i32
  }
  func.func @transform_1(%arg0: i32) -> (i32, i32) {
    %c0_i32 = arith.constant 0 : i32
    %c0_i32_0 = arith.constant 0 : i32
    %c0_i32_1 = arith.constant 0 : i32
    return %c0_i32, %c0_i32_0 : i32, i32
  }
  func.func @transform_2(%arg0: i32) -> (i32, i32) {
    %c0_i32 = arith.constant 0 : i32
    %c0_i32_0 = arith.constant 0 : i32
    %c0_i32_1 = arith.constant 0 : i32
    return %c0_i32, %c0_i32_0 : i32, i32
  }
  func.func @transform_3(%arg0: i32) -> (i32, i32, i32) {
    %c0_i32 = arith.constant 0 : i32
    %c0_i32_0 = arith.constant 0 : i32
    %c0_i32_1 = arith.constant 0 : i32
    return %arg0, %c0_i32, %c0_i32_0 : i32, i32, i32
  }
}

module attributes {stable_mosaic.version = 11 : i64} {
  func.func @_conv_pool_kernel(%arg0: i32, %arg1: memref<1x4x25x200xbf16, #tpu.memory_space<vmem>>, %arg2: memref<200x128xbf16, #tpu.memory_space<vmem>>, %arg3: memref<1x128xf32, #tpu.memory_space<vmem>>, %arg4: memref<1x25x128xbf16, #tpu.memory_space<vmem>>) attributes {dimension_semantics = [#tpu.dimension_semantics<parallel>], iteration_bounds = array<i64: 2>, scalar_prefetch = 0 : i64, scratch_operands = 0 : i64, tpu.core_type = #tpu.core_type<tc>, window_params = [{transform_indices = @transform_0, window_bounds = array<i64: 1, 4, 25, 200>}, {pipeline_mode = #tpu.pipeline_mode<synchronous>, transform_indices = @transform_1, window_bounds = array<i64: 200, 128>}, {pipeline_mode = #tpu.pipeline_mode<synchronous>, transform_indices = @transform_2, window_bounds = array<i64: 1, 128>}, {transform_indices = @transform_3, window_bounds = array<i64: 1, 25, 128>}]} {
    %c0 = arith.constant 0 : index
    %c0_0 = arith.constant 0 : index
    %0 = vector.load %arg2[%c0, %c0_0] : memref<200x128xbf16, #tpu.memory_space<vmem>>, vector<200x128xbf16>
    %c0_1 = arith.constant 0 : index
    %c0_2 = arith.constant 0 : index
    %1 = vector.load %arg3[%c0_1, %c0_2] : memref<1x128xf32, #tpu.memory_space<vmem>>, vector<1x128xf32>
    %c0_3 = arith.constant 0 : index
    %c0_4 = arith.constant 0 : index
    %c0_5 = arith.constant 0 : index
    %c0_6 = arith.constant 0 : index
    %2 = vector.load %arg1[%c0_3, %c0_4, %c0_5, %c0_6] : memref<1x4x25x200xbf16, #tpu.memory_space<vmem>>, vector<1x1x25x200xbf16>
    %3 = vector.shape_cast %2 : vector<1x1x25x200xbf16> to vector<25x200xbf16>
    %cst = arith.constant dense<0.000000e+00> : vector<25x128xf32>
    %4 = tpu.matmul %3, %0, %cst {dimension_numbers = #tpu.dot_dimension_numbers<[1], [0], [0], [1], [0, 0, 1, 1], [], []>} : vector<25x200xbf16>, vector<200x128xbf16>, vector<25x128xf32> -> vector<25x128xf32>
    %5 = vector.broadcast %1 : vector<1x128xf32> to vector<25x128xf32>
    %6 = arith.addf %4, %5 : vector<25x128xf32>
    %7 = math.tanh %6 : vector<25x128xf32>
    %c0_7 = arith.constant 0 : index
    %c1 = arith.constant 1 : index
    %c0_8 = arith.constant 0 : index
    %c0_9 = arith.constant 0 : index
    %8 = vector.load %arg1[%c0_7, %c1, %c0_8, %c0_9] : memref<1x4x25x200xbf16, #tpu.memory_space<vmem>>, vector<1x1x25x200xbf16>
    %9 = vector.shape_cast %8 : vector<1x1x25x200xbf16> to vector<25x200xbf16>
    %cst_10 = arith.constant dense<0.000000e+00> : vector<25x128xf32>
    %10 = tpu.matmul %9, %0, %cst_10 {dimension_numbers = #tpu.dot_dimension_numbers<[1], [0], [0], [1], [0, 0, 1, 1], [], []>} : vector<25x200xbf16>, vector<200x128xbf16>, vector<25x128xf32> -> vector<25x128xf32>
    %11 = vector.broadcast %1 : vector<1x128xf32> to vector<25x128xf32>
    %12 = arith.addf %10, %11 : vector<25x128xf32>
    %13 = math.tanh %12 : vector<25x128xf32>
    %14 = arith.maximumf %7, %13 : vector<25x128xf32>
    %c0_11 = arith.constant 0 : index
    %c2 = arith.constant 2 : index
    %c0_12 = arith.constant 0 : index
    %c0_13 = arith.constant 0 : index
    %15 = vector.load %arg1[%c0_11, %c2, %c0_12, %c0_13] : memref<1x4x25x200xbf16, #tpu.memory_space<vmem>>, vector<1x1x25x200xbf16>
    %16 = vector.shape_cast %15 : vector<1x1x25x200xbf16> to vector<25x200xbf16>
    %cst_14 = arith.constant dense<0.000000e+00> : vector<25x128xf32>
    %17 = tpu.matmul %16, %0, %cst_14 {dimension_numbers = #tpu.dot_dimension_numbers<[1], [0], [0], [1], [0, 0, 1, 1], [], []>} : vector<25x200xbf16>, vector<200x128xbf16>, vector<25x128xf32> -> vector<25x128xf32>
    %18 = vector.broadcast %1 : vector<1x128xf32> to vector<25x128xf32>
    %19 = arith.addf %17, %18 : vector<25x128xf32>
    %20 = math.tanh %19 : vector<25x128xf32>
    %21 = arith.maximumf %14, %20 : vector<25x128xf32>
    %c0_15 = arith.constant 0 : index
    %c3 = arith.constant 3 : index
    %c0_16 = arith.constant 0 : index
    %c0_17 = arith.constant 0 : index
    %22 = vector.load %arg1[%c0_15, %c3, %c0_16, %c0_17] : memref<1x4x25x200xbf16, #tpu.memory_space<vmem>>, vector<1x1x25x200xbf16>
    %23 = vector.shape_cast %22 : vector<1x1x25x200xbf16> to vector<25x200xbf16>
    %cst_18 = arith.constant dense<0.000000e+00> : vector<25x128xf32>
    %24 = tpu.matmul %23, %0, %cst_18 {dimension_numbers = #tpu.dot_dimension_numbers<[1], [0], [0], [1], [0, 0, 1, 1], [], []>} : vector<25x200xbf16>, vector<200x128xbf16>, vector<25x128xf32> -> vector<25x128xf32>
    %25 = vector.broadcast %1 : vector<1x128xf32> to vector<25x128xf32>
    %26 = arith.addf %24, %25 : vector<25x128xf32>
    %27 = math.tanh %26 : vector<25x128xf32>
    %28 = arith.maximumf %21, %27 : vector<25x128xf32>
    %29 = arith.truncf %28 : vector<25x128xf32> to vector<25x128xbf16>
    %c0_19 = arith.constant 0 : index
    %c0_20 = arith.constant 0 : index
    %c0_21 = arith.constant 0 : index
    %30 = vector.load %arg4[%c0_19, %c0_20, %c0_21] : memref<1x25x128xbf16, #tpu.memory_space<vmem>>, vector<1x25x128xbf16>
    %31 = vector.shape_cast %30 : vector<1x25x128xbf16> to vector<25x128xbf16>
    %32 = vector.shape_cast %29 : vector<25x128xbf16> to vector<1x25x128xbf16>
    tpu.vector_store %arg4[%c0_19, %c0_20, %c0_21], %32 {strides = array<i32>} : memref<1x25x128xbf16, #tpu.memory_space<vmem>>, vector<1x25x128xbf16>,
    return
  }
  func.func @transform_0(%arg0: i32) -> (i32, i32, i32, i32) {
    %c0_i32 = arith.constant 0 : i32
    %c0_i32_0 = arith.constant 0 : i32
    %c0_i32_1 = arith.constant 0 : i32
    %c0_i32_2 = arith.constant 0 : i32
    return %arg0, %c0_i32, %c0_i32_0, %c0_i32_1 : i32, i32, i32, i32
  }
  func.func @transform_1(%arg0: i32) -> (i32, i32) {
    %c0_i32 = arith.constant 0 : i32
    %c0_i32_0 = arith.constant 0 : i32
    %c0_i32_1 = arith.constant 0 : i32
    return %c0_i32, %c0_i32_0 : i32, i32
  }
  func.func @transform_2(%arg0: i32) -> (i32, i32) {
    %c0_i32 = arith.constant 0 : i32
    %c0_i32_0 = arith.constant 0 : i32
    %c0_i32_1 = arith.constant 0 : i32
    return %c0_i32, %c0_i32_0 : i32, i32
  }
  func.func @transform_3(%arg0: i32) -> (i32, i32, i32) {
    %c0_i32 = arith.constant 0 : i32
    %c0_i32_0 = arith.constant 0 : i32
    %c0_i32_1 = arith.constant 0 : i32
    return %arg0, %c0_i32, %c0_i32_0 : i32, i32, i32
  }
}

module attributes {stable_mosaic.version = 11 : i64} {
  func.func @_tail_kernel(%arg0: i32, %arg1: memref<1x1x400xbf16, #tpu.memory_space<vmem>>, %arg2: memref<400x128xbf16, #tpu.memory_space<vmem>>, %arg3: memref<1x128xf32, #tpu.memory_space<vmem>>, %arg4: memref<128x128xbf16, #tpu.memory_space<vmem>>, %arg5: memref<1x128xf32, #tpu.memory_space<vmem>>, %arg6: memref<128x128xbf16, #tpu.memory_space<vmem>>, %arg7: memref<1x128xf32, #tpu.memory_space<vmem>>, %arg8: memref<1x1x128xf32, #tpu.memory_space<vmem>>) attributes {dimension_semantics = [#tpu.dimension_semantics<parallel>], iteration_bounds = array<i64: 2>, scalar_prefetch = 0 : i64, scratch_operands = 0 : i64, tpu.core_type = #tpu.core_type<tc>, window_params = [{transform_indices = @transform_0, window_bounds = array<i64: 1, 1, 400>}, {pipeline_mode = #tpu.pipeline_mode<synchronous>, transform_indices = @transform_1, window_bounds = array<i64: 400, 128>}, {pipeline_mode = #tpu.pipeline_mode<synchronous>, transform_indices = @transform_2, window_bounds = array<i64: 1, 128>}, {pipeline_mode = #tpu.pipeline_mode<synchronous>, transform_indices = @transform_3, window_bounds = array<i64: 128, 128>}, {pipeline_mode = #tpu.pipeline_mode<synchronous>, transform_indices = @transform_4, window_bounds = array<i64: 1, 128>}, {pipeline_mode = #tpu.pipeline_mode<synchronous>, transform_indices = @transform_5, window_bounds = array<i64: 128, 128>}, {pipeline_mode = #tpu.pipeline_mode<synchronous>, transform_indices = @transform_6, window_bounds = array<i64: 1, 128>}, {transform_indices = @transform_7, window_bounds = array<i64: 1, 1, 128>}]} {
    %c0 = arith.constant 0 : index
    %c0_0 = arith.constant 0 : index
    %c0_1 = arith.constant 0 : index
    %0 = vector.load %arg1[%c0, %c0_0, %c0_1] : memref<1x1x400xbf16, #tpu.memory_space<vmem>>, vector<1x1x400xbf16>
    %1 = vector.shape_cast %0 : vector<1x1x400xbf16> to vector<1x400xbf16>
    %c0_2 = arith.constant 0 : index
    %c0_3 = arith.constant 0 : index
    %2 = vector.load %arg2[%c0_2, %c0_3] : memref<400x128xbf16, #tpu.memory_space<vmem>>, vector<400x128xbf16>
    %cst = arith.constant dense<0.000000e+00> : vector<1x128xf32>
    %3 = tpu.matmul %1, %2, %cst {dimension_numbers = #tpu.dot_dimension_numbers<[1], [0], [0], [1], [0, 0, 1, 1], [], []>} : vector<1x400xbf16>, vector<400x128xbf16>, vector<1x128xf32> -> vector<1x128xf32>
    %c0_4 = arith.constant 0 : index
    %c0_5 = arith.constant 0 : index
    %4 = vector.load %arg3[%c0_4, %c0_5] : memref<1x128xf32, #tpu.memory_space<vmem>>, vector<1x128xf32>
    %5 = arith.addf %3, %4 : vector<1x128xf32>
    %6 = math.tanh %5 : vector<1x128xf32>
    %7 = arith.truncf %6 : vector<1x128xf32> to vector<1x128xbf16>
    %c0_6 = arith.constant 0 : index
    %c0_7 = arith.constant 0 : index
    %8 = vector.load %arg4[%c0_6, %c0_7] : memref<128x128xbf16, #tpu.memory_space<vmem>>, vector<128x128xbf16>
    %cst_8 = arith.constant dense<0.000000e+00> : vector<1x128xf32>
    %9 = tpu.matmul %7, %8, %cst_8 {dimension_numbers = #tpu.dot_dimension_numbers<[1], [0], [0], [1], [0, 0, 1, 1], [], []>} : vector<1x128xbf16>, vector<128x128xbf16>, vector<1x128xf32> -> vector<1x128xf32>
    %c0_9 = arith.constant 0 : index
    %c0_10 = arith.constant 0 : index
    %10 = vector.load %arg5[%c0_9, %c0_10] : memref<1x128xf32, #tpu.memory_space<vmem>>, vector<1x128xf32>
    %11 = arith.addf %9, %10 : vector<1x128xf32>
    %12 = math.tanh %11 : vector<1x128xf32>
    %13 = arith.truncf %12 : vector<1x128xf32> to vector<1x128xbf16>
    %c0_11 = arith.constant 0 : index
    %c0_12 = arith.constant 0 : index
    %14 = vector.load %arg6[%c0_11, %c0_12] : memref<128x128xbf16, #tpu.memory_space<vmem>>, vector<128x128xbf16>
    %cst_13 = arith.constant dense<0.000000e+00> : vector<1x128xf32>
    %15 = tpu.matmul %13, %14, %cst_13 {dimension_numbers = #tpu.dot_dimension_numbers<[1], [0], [0], [1], [0, 0, 1, 1], [], []>} : vector<1x128xbf16>, vector<128x128xbf16>, vector<1x128xf32> -> vector<1x128xf32>
    %c0_14 = arith.constant 0 : index
    %c0_15 = arith.constant 0 : index
    %16 = vector.load %arg7[%c0_14, %c0_15] : memref<1x128xf32, #tpu.memory_space<vmem>>, vector<1x128xf32>
    %17 = arith.addf %15, %16 : vector<1x128xf32>
    %c0_16 = arith.constant 0 : index
    %c0_17 = arith.constant 0 : index
    %c0_18 = arith.constant 0 : index
    %18 = vector.load %arg8[%c0_16, %c0_17, %c0_18] : memref<1x1x128xf32, #tpu.memory_space<vmem>>, vector<1x1x128xf32>
    %19 = vector.shape_cast %18 : vector<1x1x128xf32> to vector<1x128xf32>
    %20 = vector.shape_cast %17 : vector<1x128xf32> to vector<1x1x128xf32>
    tpu.vector_store %arg8[%c0_16, %c0_17, %c0_18], %20 {strides = array<i32>} : memref<1x1x128xf32, #tpu.memory_space<vmem>>, vector<1x1x128xf32>,
    return
  }
  func.func @transform_0(%arg0: i32) -> (i32, i32, i32) {
    %c0_i32 = arith.constant 0 : i32
    %c0_i32_0 = arith.constant 0 : i32
    %c0_i32_1 = arith.constant 0 : i32
    return %arg0, %c0_i32, %c0_i32_0 : i32, i32, i32
  }
  func.func @transform_1(%arg0: i32) -> (i32, i32) {
    %c0_i32 = arith.constant 0 : i32
    %c0_i32_0 = arith.constant 0 : i32
    %c0_i32_1 = arith.constant 0 : i32
    return %c0_i32, %c0_i32_0 : i32, i32
  }
  func.func @transform_2(%arg0: i32) -> (i32, i32) {
    %c0_i32 = arith.constant 0 : i32
    %c0_i32_0 = arith.constant 0 : i32
    %c0_i32_1 = arith.constant 0 : i32
    return %c0_i32, %c0_i32_0 : i32, i32
  }
  func.func @transform_3(%arg0: i32) -> (i32, i32) {
    %c0_i32 = arith.constant 0 : i32
    %c0_i32_0 = arith.constant 0 : i32
    %c0_i32_1 = arith.constant 0 : i32
    return %c0_i32, %c0_i32_0 : i32, i32
  }
  func.func @transform_4(%arg0: i32) -> (i32, i32) {
    %c0_i32 = arith.constant 0 : i32
    %c0_i32_0 = arith.constant 0 : i32
    %c0_i32_1 = arith.constant 0 : i32
    return %c0_i32, %c0_i32_0 : i32, i32
  }
  func.func @transform_5(%arg0: i32) -> (i32, i32) {
    %c0_i32 = arith.constant 0 : i32
    %c0_i32_0 = arith.constant 0 : i32
    %c0_i32_1 = arith.constant 0 : i32
    return %c0_i32, %c0_i32_0 : i32, i32
  }
  func.func @transform_6(%arg0: i32) -> (i32, i32) {
    %c0_i32 = arith.constant 0 : i32
    %c0_i32_0 = arith.constant 0 : i32
    %c0_i32_1 = arith.constant 0 : i32
    return %c0_i32, %c0_i32_0 : i32, i32
  }
  func.func @transform_7(%arg0: i32) -> (i32, i32, i32) {
    %c0_i32 = arith.constant 0 : i32
    %c0_i32_0 = arith.constant 0 : i32
    %c0_i32_1 = arith.constant 0 : i32
    return %arg0, %c0_i32, %c0_i32_0 : i32, i32, i32
  }
}

</mosaic_0001>

<bundles_post_ra>
// kernel: lenet_forward.3
= control target key start
LH: loop header
LB: loop body
LE: loop exit
PB: predicated region body
PF: predicated region fallthrough
CT: control target
= control target key end

     0   :  { %s2500_s12 = smov 0   ;;  %s3095_s0 = inlined_call_operand.vmem [shape: bf16[2,4,196,32], index: 0, kind: input, shape index: {}]   ;;  %s3096_s1 = inlined_call_operand.vmem [shape: bf16[32,128], index: 1, kind: input, shape index: {}]   ;;  %s3097_s2 = inlined_call_operand.vmem [shape: f32[1,128], index: 2, kind: input, shape index: {}]   ;;  %s3098_s3 = inlined_call_operand.vmem [shape: bf16[2,196,128], index: 3, kind: output, shape index: {}]  }
   0x1 LB: > { %s1607_s13 = sadd.s32 4294967295, %s2476_s12   ;;  %p1611_p0 = scmp.ge.s32.totalorder %s2476_s12, 1  ;;  %s2476_s12 = sphi %s2500_s12, %s13_s12  }
   0x2   : > { %p137_p1 = scmp.lt.s32.totalorder %s2476_s12, 3 }
   0x4   : > { %p138_p2 = pnand %p1611_p0, %p137_p1 }
   0x6   : > { %141 = sbr.rel (%p138_p2) target bundleno = 436 (0x1b4), region = 32 }
   0xb   : > { %v2215_v0 = vld [vmem:[%s3096_s1 + $0x8] sm:$0xff]   ;;  %v2478_v1 = vmov 0.0   ;;  %v2216_v2 = vld [vmem:[%s3096_s1] sm:$0xff]   ;;  %p161_p3 = scmp.lt.s32.totalorder %s1607_s13, 1  ;;  %vm2479_vm0 = vmmov 0   ;;  %vm283_vm1 = vcmask 261120  }
   0xc   : > { %1979 = vmatprep.subr.bf16.mxu0 %v2478_v1  ;;  %2035 = vmatprep.subr.bf16.mxu1 %v2478_v1  ;;  %v2731_v53 = vld [vmem:[%s3097_s2] ss:$0 sm:$0xff] }
   0xd   : > { %1980 = vmatpush3.bf16.msra.mxu0 %v2215_v0  ;;  %2036 = vmatpush3.bf16.msra.mxu1 %v2215_v0  ;;  %s3137_s13 = smov (!%p161_p3, %s1607_s13), 1 }
   0xe   : > { %1981 = vmatprep.subr.bf16.mxu0 %v2478_v1  ;;  %2037 = vmatprep.subr.bf16.mxu1 %v2478_v1  ;;  %s2203_s18 = smul.u32 400, %s3137_s13 }
   0xf   : > { %1983 = vmatprep.mubr.msk.bf16.mxu0 %vm2479_vm0, %v2478_v1  ;;  %2039 = vmatprep.mubr.msk.bf16.mxu1 %vm2479_vm0, %v2478_v1  ;;  %s2204_s24 = smul.u32 100, %s3137_s13 }
  0x10   : > { %s2530_s21 = scalar_lea.vmem %s3095_s0, %s2203_s18 }
  0x11   : > { %1982 = vmatpush3.bf16.msra.mxu0 %v2216_v2  ;;  %2038 = vmatpush3.bf16.msra.mxu1 %v2216_v2  ;;  %v2217_v3 = vld [vmem:[%s2530_s21] sm:$0xff]   ;;  %v2219_v5 = vld [vmem:[%s2530_s21 + $0x8] sm:$0xff]   ;;  %v2221_v7 = vld [vmem:[%s2530_s21 + $0x10] sm:$0xff]   ;;  %s2965_s27 = scalar_lea.vmem %s3098_s3, %s2204_s24 }
  0x12   : > { %2091 = vmatprep.subr.bf16.mxu0 %v2478_v1  ;;  %2147 = vmatprep.subr.bf16.mxu1 %v2478_v1  ;;  %v2218_v4 = vld [vmem:[%s2530_s21 + $0x64] sm:$0xff]   ;;  %v2220_v6 = vld [vmem:[%s2530_s21 + $0x6c] sm:$0xff]   ;;  %v2222_v8 = vld [vmem:[%s2530_s21 + $0x74] sm:$0xff]  }
  0x13   : > { %v2223_v9 = vld [vmem:[%s2530_s21 + $0x18] sm:$0xff]   ;;  %v2225_v11 = vld [vmem:[%s2530_s21 + $0x20] sm:$0xff]   ;;  %v2227_v13 = vld [vmem:[%s2530_s21 + $0x28] sm:$0xff]  }
  0x14   : > { %1984 = vmatmul.mubr.msk.bf16.vlgmr.msra.gmra.mxu0 %vm283_vm1, %v2217_v3  ;;  %2040 = vmatmul.mubr.msk.bf16.vlgmr.msra.gmra.mxu1 %vm283_vm1, %v2218_v4  ;;  %v2224_v10 = vld [vmem:[%s2530_s21 + $0x7c] sm:$0xff]   ;;  %v2226_v12 = vld [vmem:[%s2530_s21 + $0x84] sm:$0xff]   ;;  %v2228_v14 = vld [vmem:[%s2530_s21 + $0x8c] sm:$0xff]  }
  0x15   : > { %2092 = vmatpush3.bf16.msra.mxu0 %v2215_v0  ;;  %2148 = vmatpush3.bf16.msra.mxu1 %v2215_v0  ;;  %v2229_v15 = vld [vmem:[%s2530_s21 + $0x30] sm:$0xff]   ;;  %v2231_v17 = vld [vmem:[%s2530_s21 + $0x38] sm:$0xff]   ;;  %v2233_v19 = vld [vmem:[%s2530_s21 + $0x40] sm:$0xff]  }
  0x16   : > { %1987 = vmatprep.mubr.msk.bf16.mxu0 %vm2479_vm0, %v2478_v1  ;;  %2043 = vmatprep.mubr.msk.bf16.mxu1 %vm2479_vm0, %v2478_v1  ;;  %v2230_v16 = vld [vmem:[%s2530_s21 + $0x94] sm:$0xff]   ;;  %v2232_v18 = vld [vmem:[%s2530_s21 + $0x9c] sm:$0xff]   ;;  %v2234_v20 = vld [vmem:[%s2530_s21 + $0xa4] sm:$0xff]  }
  0x17   : > { %2093 = vmatprep.subr.bf16.mxu0 %v2478_v1  ;;  %2149 = vmatprep.subr.bf16.mxu1 %v2478_v1  ;;  %v2235_v21 = vld [vmem:[%s2530_s21 + $0x48] sm:$0xff]   ;;  %v2237_v23 = vld [vmem:[%s2530_s21 + $0x50] sm:$0xff]   ;;  %v2239_v25 = vld [vmem:[%s2530_s21 + $0x58] sm:$0xff]  }
  0x18   : > { %v2236_v22 = vld [vmem:[%s2530_s21 + $0xac] sm:$0xff]   ;;  %v2238_v24 = vld [vmem:[%s2530_s21 + $0xb4] sm:$0xff]   ;;  %v2240_v26 = vld [vmem:[%s2530_s21 + $0xbc] sm:$0xff]  }
  0x19   : > { %2094 = vmatpush3.bf16.msra.mxu0 %v2216_v2  ;;  %2150 = vmatpush3.bf16.msra.mxu1 %v2216_v2  ;;  %v2241_v27 = vld [vmem:[%s2530_s21 + $0x60] ss:$0 sps:$4 sm:$0x33]   ;;  %v2242_v28 = vld [vmem:[%s2530_s21 + $0xc4] ss:$0 sps:$4 sm:$0x33]  }
  0x1a   : > { %v2243_v29 = vld [vmem:[%s2530_s21 + $0xc8] sm:$0xff]   ;;  %v2245_v31 = vld [vmem:[%s2530_s21 + $0xd0] sm:$0xff]   ;;  %v2247_v33 = vld [vmem:[%s2530_s21 + $0xd8] sm:$0xff]  }
  0x1b   : > { %v2244_v30 = vld [vmem:[%s2530_s21 + $0x12c] sm:$0xff]   ;;  %v2246_v32 = vld [vmem:[%s2530_s21 + $0x134] sm:$0xff]   ;;  %v2248_v34 = vld [vmem:[%s2530_s21 + $0x13c] sm:$0xff]  }
  0x1c   : > { %1988 = vmatmul.mubr.msk.bf16.gmra.mxu0 %vm283_vm1, %v2219_v5  ;;  %2044 = vmatmul.mubr.msk.bf16.gmra.mxu1 %vm283_vm1, %v2220_v6  ;;  %v2249_v35 = vld [vmem:[%s2530_s21 + $0xe0] sm:$0xff]   ;;  %v2251_v37 = vld [vmem:[%s2530_s21 + $0xe8] sm:$0xff]   ;;  %v2253_v39 = vld [vmem:[%s2530_s21 + $0xf0] sm:$0xff]  }
  0x1d   : > { %1991 = vmatprep.mubr.msk.bf16.mxu0 %vm2479_vm0, %v2478_v1  ;;  %2047 = vmatprep.mubr.msk.bf16.mxu1 %vm2479_vm0, %v2478_v1  ;;  %v2250_v36 = vld [vmem:[%s2530_s21 + $0x144] sm:$0xff]   ;;  %v2252_v38 = vld [vmem:[%s2530_s21 + $0x14c] sm:$0xff]   ;;  %v2254_v40 = vld [vmem:[%s2530_s21 + $0x154] sm:$0xff]  }
  0x1e   : > { %v2255_v41 = vld [vmem:[%s2530_s21 + $0xf8] sm:$0xff]   ;;  %v2257_v43 = vld [vmem:[%s2530_s21 + $0x100] sm:$0xff]   ;;  %v2259_v45 = vld [vmem:[%s2530_s21 + $0x108] sm:$0xff]  }
  0x1f   : > { %v2256_v42 = vld [vmem:[%s2530_s21 + $0x15c] sm:$0xff]   ;;  %v2258_v44 = vld [vmem:[%s2530_s21 + $0x164] sm:$0xff]   ;;  %v2260_v46 = vld [vmem:[%s2530_s21 + $0x16c] sm:$0xff]  }
  0x20   : > { %v2261_v47 = vld [vmem:[%s2530_s21 + $0x110] sm:$0xff]   ;;  %v2263_v49 = vld [vmem:[%s2530_s21 + $0x118] sm:$0xff]   ;;  %v2265_v51 = vld [vmem:[%s2530_s21 + $0x120] sm:$0xff]  }
  0x21   : > { %v2262_v48 = vld [vmem:[%s2530_s21 + $0x174] sm:$0xff]   ;;  %v2264_v50 = vld [vmem:[%s2530_s21 + $0x17c] sm:$0xff]   ;;  %v2266_v52 = vld [vmem:[%s2530_s21 + $0x184] sm:$0xff]  }
  0x22   : > { %v2267_v61 = vld [vmem:[%s2530_s21 + $0x128] ss:$0 sps:$4 sm:$0x33]   ;;  %v2268_v0 = vld [vmem:[%s2530_s21 + $0x18c] ss:$0 sps:$4 sm:$0x33]  }
  0x24   : > { %1992 = vmatmul.mubr.msk.bf16.gmra.mxu0 %vm283_vm1, %v2221_v7  ;;  %2048 = vmatmul.mubr.msk.bf16.gmra.mxu1 %vm283_vm1, %v2222_v8 }
  0x25   : > { %1995 = vmatprep.mubr.msk.bf16.mxu0 %vm2479_vm0, %v2478_v1  ;;  %2051 = vmatprep.mubr.msk.bf16.mxu1 %vm2479_vm0, %v2478_v1 }
  0x2c   : > { %1996 = vmatmul.mubr.msk.bf16.gmra.mxu0 %vm283_vm1, %v2223_v9  ;;  %2052 = vmatmul.mubr.msk.bf16.gmra.mxu1 %vm283_vm1, %v2224_v10 }
  0x2d   : > { %1999 = vmatprep.mubr.msk.bf16.mxu0 %vm2479_vm0, %v2478_v1  ;;  %2055 = vmatprep.mubr.msk.bf16.mxu1 %vm2479_vm0, %v2478_v1 }
  0x34   : > { %2000 = vmatmul.mubr.msk.bf16.gmra.mxu0 %vm283_vm1, %v2225_v11  ;;  %2056 = vmatmul.mubr.msk.bf16.gmra.mxu1 %vm283_vm1, %v2226_v12 }
  0x35   : > { %2003 = vmatprep.mubr.msk.bf16.mxu0 %vm2479_vm0, %v2478_v1  ;;  %2059 = vmatprep.mubr.msk.bf16.mxu1 %vm2479_vm0, %v2478_v1 }
  0x3c   : > { %2004 = vmatmul.mubr.msk.bf16.gmra.mxu0 %vm283_vm1, %v2227_v13  ;;  %2060 = vmatmul.mubr.msk.bf16.gmra.mxu1 %vm283_vm1, %v2228_v14 }
  0x3d   : > { %2007 = vmatprep.mubr.msk.bf16.mxu0 %vm2479_vm0, %v2478_v1  ;;  %2063 = vmatprep.mubr.msk.bf16.mxu1 %vm2479_vm0, %v2478_v1 }
  0x44   : > { %2008 = vmatmul.mubr.msk.bf16.gmra.mxu0 %vm283_vm1, %v2229_v15  ;;  %2064 = vmatmul.mubr.msk.bf16.gmra.mxu1 %vm283_vm1, %v2230_v16 }
  0x45   : > { %2011 = vmatprep.mubr.msk.bf16.mxu0 %vm2479_vm0, %v2478_v1  ;;  %2067 = vmatprep.mubr.msk.bf16.mxu1 %vm2479_vm0, %v2478_v1 }
  0x4c   : > { %2012 = vmatmul.mubr.msk.bf16.gmra.mxu0 %vm283_vm1, %v2231_v17  ;;  %2068 = vmatmul.mubr.msk.bf16.gmra.mxu1 %vm283_vm1, %v2232_v18 }
  0x4d   : > { %2015 = vmatprep.mubr.msk.bf16.mxu0 %vm2479_vm0, %v2478_v1  ;;  %2071 = vmatprep.mubr.msk.bf16.mxu1 %vm2479_vm0, %v2478_v1 }
  0x54   : > { %2016 = vmatmul.mubr.msk.bf16.gmra.mxu0 %vm283_vm1, %v2233_v19  ;;  %2072 = vmatmul.mubr.msk.bf16.gmra.mxu1 %vm283_vm1, %v2234_v20 }
  0x55   : > { %2019 = vmatprep.mubr.msk.bf16.mxu0 %vm2479_vm0, %v2478_v1  ;;  %2075 = vmatprep.mubr.msk.bf16.mxu1 %vm2479_vm0, %v2478_v1 }
  0x5c   : > { %2020 = vmatmul.mubr.msk.bf16.gmra.mxu0 %vm283_vm1, %v2235_v21  ;;  %2076 = vmatmul.mubr.msk.bf16.gmra.mxu1 %vm283_vm1, %v2236_v22 }
  0x5d   : > { %2023 = vmatprep.mubr.msk.bf16.mxu0 %vm2479_vm0, %v2478_v1  ;;  %2079 = vmatprep.mubr.msk.bf16.mxu1 %vm2479_vm0, %v2478_v1 }
  0x64   : > { %2024 = vmatmul.mubr.msk.bf16.gmra.mxu0 %vm283_vm1, %v2237_v23  ;;  %2080 = vmatmul.mubr.msk.bf16.gmra.mxu1 %vm283_vm1, %v2238_v24 }
  0x65   : > { %2027 = vmatprep.mubr.msk.bf16.mxu0 %vm2479_vm0, %v2478_v1  ;;  %2083 = vmatprep.mubr.msk.bf16.mxu1 %vm2479_vm0, %v2478_v1 }
  0x6c   : > { %2028 = vmatmul.mubr.msk.bf16.gmra.mxu0 %vm283_vm1, %v2239_v25  ;;  %2084 = vmatmul.mubr.msk.bf16.gmra.mxu1 %vm283_vm1, %v2240_v26 }
  0x6d   : > { %2031 = vmatprep.mubr.msk.bf16.mxu0 %vm2479_vm0, %v2478_v1  ;;  %2087 = vmatprep.mubr.msk.bf16.mxu1 %vm2479_vm0, %v2478_v1 }
  0x74   : > { %2032 = vmatmul.mubr.msk.bf16.gmra.mxu0 %vm283_vm1, %v2241_v27  ;;  %2088 = vmatmul.mubr.msk.bf16.gmra.mxu1 %vm283_vm1, %v2242_v28 }
  0x75   : > { %2095 = vmatprep.mubr.msk.bf16.mxu0 %vm2479_vm0, %v2478_v1  ;;  %2151 = vmatprep.mubr.msk.bf16.mxu1 %vm2479_vm0, %v2478_v1 }
  0x7c   : > { %2096 = vmatmul.mubr.msk.bf16.vlgmr.msra.gmra.mxu0 %vm283_vm1, %v2243_v29  ;;  %2152 = vmatmul.mubr.msk.bf16.vlgmr.msra.gmra.mxu1 %vm283_vm1, %v2244_v30 }
  0x7d   : > { %2099 = vmatprep.mubr.msk.bf16.mxu0 %vm2479_vm0, %v2478_v1  ;;  %2155 = vmatprep.mubr.msk.bf16.mxu1 %vm2479_vm0, %v2478_v1 }
  0x84   : > { %2100 = vmatmul.mubr.msk.bf16.gmra.mxu0 %vm283_vm1, %v2245_v31  ;;  %2156 = vmatmul.mubr.msk.bf16.gmra.mxu1 %vm283_vm1, %v2246_v32 }
  0x85   : > { %2103 = vmatprep.mubr.msk.bf16.mxu0 %vm2479_vm0, %v2478_v1  ;;  %2159 = vmatprep.mubr.msk.bf16.mxu1 %vm2479_vm0, %v2478_v1 }
  0x8c   : > { %2104 = vmatmul.mubr.msk.bf16.gmra.mxu0 %vm283_vm1, %v2247_v33  ;;  %2160 = vmatmul.mubr.msk.bf16.gmra.mxu1 %vm283_vm1, %v2248_v34 }
  0x8d   : > { %2107 = vmatprep.mubr.msk.bf16.mxu0 %vm2479_vm0, %v2478_v1  ;;  %2163 = vmatprep.mubr.msk.bf16.mxu1 %vm2479_vm0, %v2478_v1 }
  0x94   : > { %2108 = vmatmul.mubr.msk.bf16.gmra.mxu0 %vm283_vm1, %v2249_v35  ;;  %2164 = vmatmul.mubr.msk.bf16.gmra.mxu1 %vm283_vm1, %v2250_v36 }
  0x95   : > { %2111 = vmatprep.mubr.msk.bf16.mxu0 %vm2479_vm0, %v2478_v1  ;;  %2167 = vmatprep.mubr.msk.bf16.mxu1 %vm2479_vm0, %v2478_v1 }
  0x9c   : > { %2112 = vmatmul.mubr.msk.bf16.gmra.mxu0 %vm283_vm1, %v2251_v37  ;;  %2168 = vmatmul.mubr.msk.bf16.gmra.mxu1 %vm283_vm1, %v2252_v38 }
  0x9d   : > { %2115 = vmatprep.mubr.msk.bf16.mxu0 %vm2479_vm0, %v2478_v1  ;;  %2171 = vmatprep.mubr.msk.bf16.mxu1 %vm2479_vm0, %v2478_v1 }
  0xa4   : > { %2116 = vmatmul.mubr.msk.bf16.gmra.mxu0 %vm283_vm1, %v2253_v39  ;;  %2172 = vmatmul.mubr.msk.bf16.gmra.mxu1 %vm283_vm1, %v2254_v40 }
  0xa5   : > { %2119 = vmatprep.mubr.msk.bf16.mxu0 %vm2479_vm0, %v2478_v1  ;;  %2175 = vmatprep.mubr.msk.bf16.mxu1 %vm2479_vm0, %v2478_v1 }
  0xac   : > { %2120 = vmatmul.mubr.msk.bf16.gmra.mxu0 %vm283_vm1, %v2255_v41  ;;  %2176 = vmatmul.mubr.msk.bf16.gmra.mxu1 %vm283_vm1, %v2256_v42 }
  0xad   : > { %2123 = vmatprep.mubr.msk.bf16.mxu0 %vm2479_vm0, %v2478_v1  ;;  %2179 = vmatprep.mubr.msk.bf16.mxu1 %vm2479_vm0, %v2478_v1 }
  0xb4   : > { %2124 = vmatmul.mubr.msk.bf16.gmra.mxu0 %vm283_vm1, %v2257_v43  ;;  %2180 = vmatmul.mubr.msk.bf16.gmra.mxu1 %vm283_vm1, %v2258_v44 }
  0xb5   : > { %2127 = vmatprep.mubr.msk.bf16.mxu0 %vm2479_vm0, %v2478_v1  ;;  %2183 = vmatprep.mubr.msk.bf16.mxu1 %vm2479_vm0, %v2478_v1 }
  0xbc   : > { %2128 = vmatmul.mubr.msk.bf16.gmra.mxu0 %vm283_vm1, %v2259_v45  ;;  %2184 = vmatmul.mubr.msk.bf16.gmra.mxu1 %vm283_vm1, %v2260_v46 }
  0xbd   : > { %2131 = vmatprep.mubr.msk.bf16.mxu0 %vm2479_vm0, %v2478_v1  ;;  %2187 = vmatprep.mubr.msk.bf16.mxu1 %vm2479_vm0, %v2478_v1 }
  0xc4   : > { %2132 = vmatmul.mubr.msk.bf16.gmra.mxu0 %vm283_vm1, %v2261_v47  ;;  %2188 = vmatmul.mubr.msk.bf16.gmra.mxu1 %vm283_vm1, %v2262_v48 }
  0xc5   : > { %2135 = vmatprep.mubr.msk.bf16.mxu0 %vm2479_vm0, %v2478_v1  ;;  %2191 = vmatprep.mubr.msk.bf16.mxu1 %vm2479_vm0, %v2478_v1 }
  0xcc   : > { %2136 = vmatmul.mubr.msk.bf16.gmra.mxu0 %vm283_vm1, %v2263_v49  ;;  %2192 = vmatmul.mubr.msk.bf16.gmra.mxu1 %vm283_vm1, %v2264_v50 }
  0xcd   : > { %2139 = vmatprep.mubr.msk.bf16.mxu0 %vm2479_vm0, %v2478_v1  ;;  %2195 = vmatprep.mubr.msk.bf16.mxu1 %vm2479_vm0, %v2478_v1 }
  0xd4   : > { %v357_v54 = vpop.f32.mrf.mxu0  ;;  %2140 = vmatmul.mubr.msk.bf16.gmra.mxu0 %vm283_vm1, %v2265_v51  ;;  %v646_v56 = vpop.f32.mrf.mxu1  ;;  %2196 = vmatmul.mubr.msk.bf16.gmra.mxu1 %vm283_vm1, %v2266_v52 }
  0xd5   : > { %v358_v55 = vadd.f32 %v2731_v53, %v357_v54  ;;  %2143 = vmatprep.mubr.msk.bf16.mxu0 %vm2479_vm0, %v2478_v1  ;;  %v647_v57 = vadd.f32 %v2731_v53, %v646_v56  ;;  %2199 = vmatprep.mubr.msk.bf16.mxu1 %vm2479_vm0, %v2478_v1 }
  0xd6   : > { %v1985_v58 = vpop.f32.mrf.mxu0  ;;  %v2041_v59 = vpop.f32.mrf.mxu1 }
  0xd7   : > { %2269 = vtanh.f32 %v358_v55 }
  0xd8   : > { %2271 = vtanh.f32 %v647_v57  ;;  %v360_v60 = vpop.f32.mrf.mxu0  ;;  %v649_v63 = vpop.f32.mrf.mxu1 }
  0xd9   : > { %v361_v62 = vadd.f32 %v2731_v53, %v360_v60  ;;  %v650_v2 = vadd.f32 %v2731_v53, %v649_v63 }
  0xda   : > { %v1986_v3 = vpop.f32.mrf.mxu0  ;;  %v2042_v4 = vpop.f32.mrf.mxu1 }
  0xdb   : > { %2273 = vtanh.f32 %v361_v62 }
  0xdc   : > { %2275 = vtanh.f32 %v650_v2  ;;  %v365_v5 = vpop.f32.mrf.mxu0  ;;  %2144 = vmatmul.mubr.msk.bf16.gmra.mxu0 %vm283_vm1, %v2267_v61  ;;  %v654_v6 = vpop.f32.mrf.mxu1  ;;  %2200 = vmatmul.mubr.msk.bf16.gmra.mxu1 %vm283_vm1, %v2268_v0 }
  0xdd   : > { %v366_v1 = vadd.f32 %v2731_v53, %v365_v5  ;;  %v655_v7 = vadd.f32 %v2731_v53, %v654_v6 }
  0xde   : > { %v1989_v8 = vpop.f32.mrf.mxu0  ;;  %v2045_v9 = vpop.f32.mrf.mxu1 }
  0xdf   : > { %2277 = vtanh.f32 %v366_v1 }
  0xe0   : > { %2279 = vtanh.f32 %v655_v7  ;;  %v368_v10 = vpop.f32.mrf.mxu0  ;;  %v657_v12 = vpop.f32.mrf.mxu1 }
  0xe1   : > { %v369_v11 = vadd.f32 %v2731_v53, %v368_v10  ;;  %v658_v13 = vadd.f32 %v2731_v53, %v657_v12 }
  0xe2   : > { %v1990_v14 = vpop.f32.mrf.mxu0  ;;  %v2046_v15 = vpop.f32.mrf.mxu1 }
  0xe3   : > { %2281 = vtanh.f32 %v369_v11 }
  0xe4   : > { %v2751_v16 = vpop.eup %2269  ;;  %2283 = vtanh.f32 %v658_v13  ;;  %v373_v17 = vpop.f32.mrf.mxu0 }
  0xe5   : > { %v2753_v18 = vpop.eup %2271  ;;  %v374_v19 = vadd.f32 %v2731_v53, %v373_v17  ;;  %v662_v20 = vpop.f32.mrf.mxu1 }
  0xe6   : > { %v663_v22 = vadd.f32 %v2731_v53, %v662_v20  ;;  %v1993_v23 = vpop.f32.mrf.mxu0 }
  0xe7   : > { %2285 = vtanh.f32 %v374_v19  ;;  %v2049_v24 = vpop.f32.mrf.mxu1 }
  0xe8   : > { %v2759_v25 = vpop.eup %2273  ;;  %2287 = vtanh.f32 %v663_v22  ;;  %v376_v26 = vpop.f32.mrf.mxu0 }
  0xe9   : > { %v2761_v27 = vpop.eup %2275  ;;  %v377_v28 = vadd.f32 %v2731_v53, %v376_v26  ;;  %v665_v29 = vpop.f32.mrf.mxu1 }
  0xea   : > { %v666_v31 = vadd.f32 %v2731_v53, %v665_v29  ;;  %v1994_v32 = vpop.f32.mrf.mxu0 }
  0xeb   : > { %2289 = vtanh.f32 %v377_v28  ;;  %v2050_v33 = vpop.f32.mrf.mxu1 }
  0xec   : > { %v2767_v34 = vpop.eup %2277  ;;  %2291 = vtanh.f32 %v666_v31  ;;  %v381_v35 = vpop.f32.mrf.mxu0 }
  0xed   : > { %v2769_v36 = vpop.eup %2279  ;;  %v382_v37 = vadd.f32 %v2731_v53, %v381_v35  ;;  %v670_v38 = vpop.f32.mrf.mxu1 }
  0xee   : > { %v671_v40 = vadd.f32 %v2731_v53, %v670_v38  ;;  %v1997_v41 = vpop.f32.mrf.mxu0 }
  0xef   : > { %2293 = vtanh.f32 %v382_v37  ;;  %v2053_v42 = vpop.f32.mrf.mxu1 }
  0xf0   : > { %v2775_v43 = vpop.eup %2281  ;;  %2295 = vtanh.f32 %v671_v40  ;;  %v384_v44 = vpop.f32.mrf.mxu0 }
  0xf1   : > { %v2777_v45 = vpop.eup %2283  ;;  %v385_v46 = vadd.f32 %v2731_v53, %v384_v44  ;;  %v673_v47 = vpop.f32.mrf.mxu1 }
  0xf2   : > { %v674_v49 = vadd.f32 %v2731_v53, %v673_v47  ;;  %v1998_v50 = vpop.f32.mrf.mxu0 }
  0xf3   : > { %2297 = vtanh.f32 %v385_v46  ;;  %v2054_v51 = vpop.f32.mrf.mxu1 }
  0xf4   : > { %v2783_v52 = vpop.eup %2285  ;;  %2299 = vtanh.f32 %v674_v49  ;;  %v389_v54 = vpop.f32.mrf.mxu0 }
  0xf5   : > { %v2785_v55 = vpop.eup %2287  ;;  %v390_v56 = vadd.f32 %v2731_v53, %v389_v54  ;;  %v678_v57 = vpop.f32.mrf.mxu1 }
  0xf6   : > { %v679_v59 = vadd.f32 %v2731_v53, %v678_v57  ;;  %v2001_v60 = vpop.f32.mrf.mxu0 }
  0xf7   : > { %2301 = vtanh.f32 %v390_v56  ;;  %v2057_v61 = vpop.f32.mrf.mxu1 }
  0xf8   : > { %v2791_v62 = vpop.eup %2289  ;;  %2303 = vtanh.f32 %v679_v59  ;;  %v392_v63 = vpop.f32.mrf.mxu0 }
  0xf9   : > { %v2793_v0 = vpop.eup %2291  ;;  %v393_v2 = vadd.f32 %v2731_v53, %v392_v63  ;;  %v681_v3 = vpop.f32.mrf.mxu1 }
  0xfa   : > { %v682_v5 = vadd.f32 %v2731_v53, %v681_v3  ;;  %v2002_v1 = vpop.f32.mrf.mxu0 }
  0xfb   : > { %2305 = vtanh.f32 %v393_v2  ;;  %v2058_v6 = vpop.f32.mrf.mxu1 }
  0xfc   : > { %v2799_v7 = vpop.eup %2293  ;;  %2307 = vtanh.f32 %v682_v5  ;;  %v397_v8 = vpop.f32.mrf.mxu0 }
  0xfd   : > { %v2801_v9 = vpop.eup %2295  ;;  %v398_v10 = vadd.f32 %v2731_v53, %v397_v8  ;;  %v686_v11 = vpop.f32.mrf.mxu1 }
  0xfe   : > { %v687_v13 = vadd.f32 %v2731_v53, %v686_v11  ;;  %v2005_v14 = vpop.f32.mrf.mxu0 }
  0xff   : > { %2309 = vtanh.f32 %v398_v10  ;;  %v2061_v15 = vpop.f32.mrf.mxu1 }
 0x100   : > { %v2807_v17 = vpop.eup %2297  ;;  %2311 = vtanh.f32 %v687_v13  ;;  %v400_v19 = vpop.f32.mrf.mxu0 }
 0x101   : > { %v2809_v20 = vpop.eup %2299  ;;  %v401_v22 = vadd.f32 %v2731_v53, %v400_v19  ;;  %v689_v23 = vpop.f32.mrf.mxu1 }
 0x102   : > { %v690_v26 = vadd.f32 %v2731_v53, %v689_v23  ;;  %v2006_v28 = vpop.f32.mrf.mxu0 }
 0x103   : > { %2313 = vtanh.f32 %v401_v22  ;;  %v2062_v29 = vpop.f32.mrf.mxu1 }
 0x104   : > { %v2815_v31 = vpop.eup %2301  ;;  %2315 = vtanh.f32 %v690_v26  ;;  %v405_v32 = vpop.f32.mrf.mxu0 }
 0x105   : > { %v2817_v33 = vpop.eup %2303  ;;  %v406_v35 = vadd.f32 %v2731_v53, %v405_v32  ;;  %v694_v37 = vpop.f32.mrf.mxu1 }
 0x106   : > { %v695_v40 = vadd.f32 %v2731_v53, %v694_v37  ;;  %v2009_v41 = vpop.f32.mrf.mxu0 }
 0x107   : > { %2317 = vtanh.f32 %v406_v35  ;;  %v2065_v42 = vpop.f32.mrf.mxu1 }
 0x108   : > { %v2823_v44 = vpop.eup %2305  ;;  %2319 = vtanh.f32 %v695_v40  ;;  %v408_v46 = vpop.f32.mrf.mxu0 }
 0x109   : > { %v2825_v47 = vpop.eup %2307  ;;  %v409_v49 = vadd.f32 %v2731_v53, %v408_v46  ;;  %v697_v50 = vpop.f32.mrf.mxu1 }
 0x10a   : > { %v698_v54 = vadd.f32 %v2731_v53, %v697_v50  ;;  %v2010_v56 = vpop.f32.mrf.mxu0 }
 0x10b   : > { %2321 = vtanh.f32 %v409_v49  ;;  %v2066_v57 = vpop.f32.mrf.mxu1 }
 0x10c   : > { %v2831_v59 = vpop.eup %2309  ;;  %2323 = vtanh.f32 %v698_v54  ;;  %v413_v60 = vpop.f32.mrf.mxu0 }
 0x10d   : > { %v2833_v61 = vpop.eup %2311  ;;  %v414_v63 = vadd.f32 %v2731_v53, %v413_v60  ;;  %v702_v2 = vpop.f32.mrf.mxu1 }
 0x10e   : > { %v703_v5 = vadd.f32 %v2731_v53, %v702_v2  ;;  %v2013_v1 = vpop.f32.mrf.mxu0 }
 0x10f   : > { %2325 = vtanh.f32 %v414_v63  ;;  %v2069_v6 = vpop.f32.mrf.mxu1 }
 0x110   : > { %v2839_v8 = vpop.eup %2313  ;;  %2327 = vtanh.f32 %v703_v5  ;;  %v416_v10 = vpop.f32.mrf.mxu0 }
 0x111   : > { %v2841_v11 = vpop.eup %2315  ;;  %v417_v13 = vadd.f32 %v2731_v53, %v416_v10  ;;  %v705_v14 = vpop.f32.mrf.mxu1 }
 0x112   : > { %v706_v19 = vadd.f32 %v2731_v53, %v705_v14  ;;  %v2014_v22 = vpop.f32.mrf.mxu0 }
 0x113   : > { %2329 = vtanh.f32 %v417_v13  ;;  %v2070_v23 = vpop.f32.mrf.mxu1 }
 0x114   : > { %v2847_v26 = vpop.eup %2317  ;;  %2331 = vtanh.f32 %v706_v19  ;;  %v421_v28 = vpop.f32.mrf.mxu0 }
 0x115   : > { %v2849_v29 = vpop.eup %2319  ;;  %v422_v32 = vadd.f32 %v2731_v53, %v421_v28  ;;  %v710_v35 = vpop.f32.mrf.mxu1 }
 0x116   : > { %v711_v40 = vadd.f32 %v2731_v53, %v710_v35  ;;  %v2017_v41 = vpop.f32.mrf.mxu0 }
 0x117   : > { %2333 = vtanh.f32 %v422_v32  ;;  %v2073_v42 = vpop.f32.mrf.mxu1 }
 0x118   : > { %v2855_v46 = vpop.eup %2321  ;;  %2335 = vtanh.f32 %v711_v40  ;;  %v424_v49 = vpop.f32.mrf.mxu0 }
 0x119   : > { %v2857_v50 = vpop.eup %2323  ;;  %v425_v54 = vadd.f32 %v2731_v53, %v424_v49  ;;  %v713_v56 = vpop.f32.mrf.mxu1 }
 0x11a   : > { %v714_v60 = vadd.f32 %v2731_v53, %v713_v56  ;;  %v2018_v63 = vpop.f32.mrf.mxu0 }
 0x11b   : > { %2337 = vtanh.f32 %v425_v54  ;;  %v2074_v2 = vpop.f32.mrf.mxu1 }
 0x11c   : > { %v2863_v5 = vpop.eup %2325  ;;  %2339 = vtanh.f32 %v714_v60  ;;  %v429_v1 = vpop.f32.mrf.mxu0 }
 0x11d   : > { %v2865_v6 = vpop.eup %2327  ;;  %v430_v10 = vadd.f32 %v2731_v53, %v429_v1  ;;  %v718_v13 = vpop.f32.mrf.mxu1 }
 0x11e   : > { %v719_v19 = vadd.f32 %v2731_v53, %v718_v13  ;;  %v2021_v22 = vpop.f32.mrf.mxu0 }
 0x11f   : > { %2341 = vtanh.f32 %v430_v10  ;;  %v2077_v23 = vpop.f32.mrf.mxu1 }
 0x120   : > { %v2871_v28 = vpop.eup %2329  ;;  %2343 = vtanh.f32 %v719_v19  ;;  %v432_v32 = vpop.f32.mrf.mxu0 }
 0x121   : > { %v2873_v35 = vpop.eup %2331  ;;  %v433_v40 = vadd.f32 %v2731_v53, %v432_v32  ;;  %v721_v41 = vpop.f32.mrf.mxu1 }
 0x122   : > { %v722_v49 = vadd.f32 %v2731_v53, %v721_v41  ;;  %v2022_v54 = vpop.f32.mrf.mxu0 }
 0x123   : > { %2345 = vtanh.f32 %v433_v40  ;;  %v2078_v56 = vpop.f32.mrf.mxu1 }
 0x124   : > { %v2879_v60 = vpop.eup %2333  ;;  %2347 = vtanh.f32 %v722_v49  ;;  %v437_v63 = vpop.f32.mrf.mxu0 }
 0x125   : > { %v2881_v2 = vpop.eup %2335  ;;  %v438_v1 = vadd.f32 %v2731_v53, %v437_v63  ;;  %v726_v10 = vpop.f32.mrf.mxu1 }
 0x126   : > { %v727_v19 = vadd.f32 %v2731_v53, %v726_v10  ;;  %v2025_v22 = vpop.f32.mrf.mxu0 }
 0x127   : > { %2349 = vtanh.f32 %v438_v1  ;;  %v2081_v23 = vpop.f32.mrf.mxu1 }
 0x128   : > { %v2887_v32 = vpop.eup %2337  ;;  %2351 = vtanh.f32 %v727_v19  ;;  %v440_v40 = vpop.f32.mrf.mxu0 }
 0x129   : > { %v2889_v41 = vpop.eup %2339  ;;  %v441_v49 = vadd.f32 %v2731_v53, %v440_v40  ;;  %v729_v54 = vpop.f32.mrf.mxu1 }
 0x12a   : > { %v730_v63 = vadd.f32 %v2731_v53, %v729_v54  ;;  %v2026_v13 = vpop.f32.mrf.mxu0 }
 0x12b   : > { %2353 = vtanh.f32 %v441_v49  ;;  %v2082_v10 = vpop.f32.mrf.mxu1 }
 0x12c   : > { %v2895_v22 = vpop.eup %2341  ;;  %2355 = vtanh.f32 %v730_v63  ;;  %v445_v1 = vpop.f32.mrf.mxu0 }
 0x12d   : > { %v2897_v23 = vpop.eup %2343  ;;  %v446_v19 = vadd.f32 %v2731_v53, %v445_v1  ;;  %v734_v42 = vpop.f32.mrf.mxu1 }
 0x12e   : > { %v735_v14 = vadd.f32 %v2731_v53, %v734_v42  ;;  %v2029_v56 = vpop.f32.mrf.mxu0 }
 0x12f   : > { %2357 = vtanh.f32 %v446_v19  ;;  %v2085_v54 = vpop.f32.mrf.mxu1 }
 0x130   : > { %v2903_v13 = vpop.eup %2345  ;;  %2359 = vtanh.f32 %v735_v14  ;;  %v448_v49 = vpop.f32.mrf.mxu0 }
 0x131   : > { %v2905_v10 = vpop.eup %2347  ;;  %v449_v63 = vadd.f32 %v2731_v53, %v448_v49  ;;  %v737_v57 = vpop.f32.mrf.mxu1 }
 0x132   : > { %v738_v37 = vadd.f32 %v2731_v53, %v737_v57  ;;  %v2030_v40 = vpop.f32.mrf.mxu0 }
 0x133   : > { %2361 = vtanh.f32 %v449_v63  ;;  %v2086_v42 = vpop.f32.mrf.mxu1 }
 0x134   : > { %v2911_v56 = vpop.eup %2349  ;;  %2363 = vtanh.f32 %v738_v37  ;;  %v453_v19 = vpop.f32.mrf.mxu0 }
 0x135   : > { %v2913_v54 = vpop.eup %2351  ;;  %v454_v14 = vadd.f32 %v2731_v53, %v453_v19  ;;  %v742_v15 = vpop.f32.mrf.mxu1 }
 0x136   : > { %v743_v3 = vadd.f32 %v2731_v53, %v742_v15  ;;  %v2033_v1 = vpop.f32.mrf.mxu0 }
 0x137   : > { %2365 = vtanh.f32 %v454_v14  ;;  %v2089_v57 = vpop.f32.mrf.mxu1 }
 0x138   : > { %v2919_v40 = vpop.eup %2353  ;;  %2367 = vtanh.f32 %v743_v3  ;;  %v456_v63 = vpop.f32.mrf.mxu0 }
 0x139   : > { %v2921_v42 = vpop.eup %2355  ;;  %v745_v37 = vpop.f32.mrf.mxu1 }
 0x13a   : > { %v2034_v19 = vpop.f32.mrf.mxu0 }
 0x13b   : > { %v2090_v38 = vpop.f32.mrf.mxu1 }
 0x13c   : > { %v2925_v24 = vpop.eup %2357  ;;  %v960_v49 = vpop.f32.mrf.mxu0 }
 0x13d   : > { %v2927_v12 = vpop.eup %2359  ;;  %v961_v15 = vadd.f32 %v2731_v53, %v960_v49  ;;  %v1274_v1 = vpop.f32.mrf.mxu1 }
 0x13e   : > { %v1275_v14 = vadd.f32 %v2731_v53, %v1274_v1  ;;  %v2097_v57 = vpop.f32.mrf.mxu0 }
 0x13f   : > { %2369 = vtanh.f32 %v961_v15  ;;  %v2153_v63 = vpop.f32.mrf.mxu1 }
 0x140   : > { %v2933_v37 = vpop.eup %2361  ;;  %v963_v19 = vpop.f32.mrf.mxu0  ;;  %2371 = vtanh.f32 %v1275_v14 }
 0x141   : > { %3103 = vst [vmem:[#allocation2_spill] sm:$0xff] %v2933_v37  ;;  %v2935_v38 = vpop.eup %2363  ;;  %v964_v51 = vadd.f32 %v2731_v53, %v963_v19  ;;  %v1277_v4 = vpop.f32.mrf.mxu1 }
 0x142   : > { %3104 = vst [vmem:[#allocation3_spill] sm:$0xff] %v2935_v38  ;;  %v1278_v58 = vadd.f32 %v2731_v53, %v1277_v4  ;;  %v2098_v3 = vpop.f32.mrf.mxu0 }
 0x143   : > { %2373 = vtanh.f32 %v964_v51  ;;  %v2154_v1 = vpop.f32.mrf.mxu1 }
 0x144   : > { %v2941_v57 = vpop.eup %2365  ;;  %v968_v15 = vpop.f32.mrf.mxu0  ;;  %2375 = vtanh.f32 %v1278_v58 }
 0x145   : > { %3105 = vst [vmem:[#allocation4_spill] sm:$0xff] %v2941_v57  ;;  %v2943_v63 = vpop.eup %2367  ;;  %v969_v48 = vadd.f32 %v2731_v53, %v968_v15  ;;  %v1282_v39 = vpop.f32.mrf.mxu1 }
 0x146   : > { %3106 = vst [vmem:[#allocation5_spill] sm:$0xff] %v2943_v63  ;;  %v1283_v49 = vadd.f32 %v2731_v53, %v1282_v39  ;;  %v2101_v14 = vpop.f32.mrf.mxu0 }
 0x147   : > { %2377 = vtanh.f32 %v969_v48  ;;  %v2157_v4 = vpop.f32.mrf.mxu1 }
 0x148   : > { %v971_v3 = vpop.f32.mrf.mxu0  ;;  %2379 = vtanh.f32 %v1283_v49 }
 0x149   : > { %v972_v51 = vadd.f32 %v2731_v53, %v971_v3  ;;  %v1285_v1 = vpop.f32.mrf.mxu1  ;;  %v3107_v3 = vmax.f32 %v2751_v16, %v2753_v18 }
 0x14a   : > { %v1286_v30 = vadd.f32 %v2731_v53, %v1285_v1  ;;  %v2102_v58 = vpop.f32.mrf.mxu0 }
 0x14b   : > { %2381 = vtanh.f32 %v972_v51  ;;  %v2158_v15 = vpop.f32.mrf.mxu1  ;;  %v3108_v58 = vmax.f32 %v2759_v25, %v2761_v27 }
 0x14c   : > { %v2370_v21 = vpop.eup %2369  ;;  %v976_v38 = vpop.f32.mrf.mxu0  ;;  %2383 = vtanh.f32 %v1286_v30 }
 0x14d   : > { %v977_v19 = vadd.f32 %v2731_v53, %v976_v38  ;;  %v1290_v39 = vpop.f32.mrf.mxu1  ;;  %v2372_v4 = vpop.eup %2371  ;;  %v1087_v49 = vmax.f32 %v3107_v3, %v2370_v21 }
 0x14e   : > { %v1291_v48 = vadd.f32 %v2731_v53, %v1290_v39  ;;  %v2105_v14 = vpop.f32.mrf.mxu0 }
 0x14f   : > { %2385 = vtanh.f32 %v977_v19  ;;  %v2161_v1 = vpop.f32.mrf.mxu1  ;;  %v1401_v37 = vmax.f32 %v1087_v49, %v2372_v4 }
 0x150   : > { %v2374_v63 = vpop.eup %2373  ;;  %v979_v51 = vpop.f32.mrf.mxu0  ;;  %2387 = vtanh.f32 %v1291_v48 }
 0x151   : > { %v1088_v30 = vmax.f32 %v3108_v58, %v2374_v63  ;;  %v980_v38 = vadd.f32 %v2731_v53, %v979_v51  ;;  %v1293_v15 = vpop.f32.mrf.mxu1  ;;  %v2376_v57 = vpop.eup %2375 }
 0x152   : > { %v1294_v39 = vadd.f32 %v2731_v53, %v1293_v15  ;;  %v2106_v14 = vpop.f32.mrf.mxu0 }
 0x153   : > { %v1402_v16 = vmax.f32 %v1088_v30, %v2376_v57  ;;  %2389 = vtanh.f32 %v980_v38  ;;  %v2162_v18 = vpop.f32.mrf.mxu1  ;;  %v3109_v57 = vmax.f32 %v2767_v34, %v2769_v36 }
 0x154   : > { %v2378_v21 = vpop.eup %2377  ;;  %v984_v25 = vpop.f32.mrf.mxu0  ;;  %2391 = vtanh.f32 %v1294_v39 }
 0x155   : > { %v1851_v27 = vpack.c.bf16 %v1402_v16, %v1401_v37  ;;  %v985_v63 = vadd.f32 %v2731_v53, %v984_v25  ;;  %v1298_v19 = vpop.f32.mrf.mxu1  ;;  %v2380_v4 = vpop.eup %2379  ;;  %v1089_v49 = vmax.f32 %v3109_v57, %v2378_v21  ;;  %v3110_v37 = vmax.f32 %v2775_v43, %v2777_v45 }
 0x156   : > { %v1299_v48 = vadd.f32 %v2731_v53, %v1298_v19  ;;  %v2109_v3 = vpop.f32.mrf.mxu0 }
 0x157   : > { %1852 = vst [vmem:[%s2965_s27] sm:$0xff] %v1851_v27   ;;  %2393 = vtanh.f32 %v985_v63  ;;  %v2165_v1 = vpop.f32.mrf.mxu1  ;;  %v1403_v18 = vmax.f32 %v1089_v49, %v2380_v4 }
 0x158   : > { %v2382_v51 = vpop.eup %2381  ;;  %v987_v58 = vpop.f32.mrf.mxu0  ;;  %2395 = vtanh.f32 %v1299_v48  ;;  %v3111_v48 = vmax.f32 %v2783_v52, %v2785_v55 }
 0x159   : > { %v1090_v30 = vmax.f32 %v3110_v37, %v2382_v51  ;;  %v988_v38 = vadd.f32 %v2731_v53, %v987_v58  ;;  %v1301_v15 = vpop.f32.mrf.mxu1  ;;  %v2384_v39 = vpop.eup %2383  ;;  %v3112_v51 = vmax.f32 %v2791_v62, %v2793_v0 }
 0x15a   : > { %v1302_v14 = vadd.f32 %v2731_v53, %v1301_v15  ;;  %v2110_v16 = vpop.f32.mrf.mxu0 }
 0x15b   : > { %v1404_v34 = vmax.f32 %v1090_v30, %v2384_v39  ;;  %2397 = vtanh.f32 %v988_v38  ;;  %v2166_v36 = vpop.f32.mrf.mxu1 }
 0x15c   : > { %v2386_v21 = vpop.eup %2385  ;;  %v992_v25 = vpop.f32.mrf.mxu0  ;;  %2399 = vtanh.f32 %v1302_v14 }
 0x15d   : > { %v1856_v27 = vpack.c.bf16 %v1404_v34, %v1403_v18  ;;  %v993_v43 = vadd.f32 %v2731_v53, %v992_v25  ;;  %v1306_v45 = vpop.f32.mrf.mxu1  ;;  %v2388_v3 = vpop.eup %2387  ;;  %v1091_v57 = vmax.f32 %v3111_v48, %v2386_v21 }
 0x15e   : > { %v1307_v63 = vadd.f32 %v2731_v53, %v1306_v45  ;;  %v2113_v19 = vpop.f32.mrf.mxu0 }
 0x15f   : > { %1908 = vst [vmem:[%s2965_s27 + $0x8] sm:$0xff] %v1856_v27   ;;  %2401 = vtanh.f32 %v993_v43  ;;  %v2169_v4 = vpop.f32.mrf.mxu1  ;;  %v1405_v14 = vmax.f32 %v1091_v57, %v2388_v3  ;;  %v3113_v27 = vmax.f32 %v2799_v7, %v2801_v9  ;;  %v3114_v3 = vmax.f32 %v2807_v17, %v2809_v20 }
 0x160   : > { %v2390_v49 = vpop.eup %2389  ;;  %v995_v1 = vpop.f32.mrf.mxu0  ;;  %2403 = vtanh.f32 %v1307_v63 }
 0x161   : > { %v1092_v58 = vmax.f32 %v3112_v51, %v2390_v49  ;;  %v996_v37 = vadd.f32 %v2731_v53, %v995_v1  ;;  %v1309_v30 = vpop.f32.mrf.mxu1  ;;  %v2392_v38 = vpop.eup %2391 }
 0x162   : > { %v1310_v15 = vadd.f32 %v2731_v53, %v1309_v30  ;;  %v2114_v39 = vpop.f32.mrf.mxu0 }
 0x163   : > { %v1406_v52 = vmax.f32 %v1092_v58, %v2392_v38  ;;  %2405 = vtanh.f32 %v996_v37  ;;  %v2170_v55 = vpop.f32.mrf.mxu1 }
 0x164   : > { %v2394_v16 = vpop.eup %2393  ;;  %v1000_v18 = vpop.f32.mrf.mxu0  ;;  %2407 = vtanh.f32 %v1310_v15 }
 0x165   : > { %v1861_v34 = vpack.c.bf16 %v1406_v52, %v1405_v14  ;;  %v1001_v62 = vadd.f32 %v2731_v53, %v1000_v18  ;;  %v1314_v0 = vpop.f32.mrf.mxu1  ;;  %v2396_v25 = vpop.eup %2395  ;;  %v1093_v43 = vmax.f32 %v3113_v27, %v2394_v16  ;;  %v3115_v52 = vmax.f32 %v2815_v31, %v2817_v33 }
 0x166   : > { %v1315_v36 = vadd.f32 %v2731_v53, %v1314_v0  ;;  %v2117_v21 = vpop.f32.mrf.mxu0 }
 0x167   : > { %1909 = vst [vmem:[%s2965_s27 + $0x10] sm:$0xff] %v1861_v34   ;;  %2409 = vtanh.f32 %v1001_v62  ;;  %v2173_v45 = vpop.f32.mrf.mxu1  ;;  %v1407_v58 = vmax.f32 %v1093_v43, %v2396_v25  ;;  %v3116_v62 = vmax.f32 %v2823_v44, %v2825_v47 }
 0x168   : > { %v2398_v63 = vpop.eup %2397  ;;  %v1003_v19 = vpop.f32.mrf.mxu0  ;;  %2411 = vtanh.f32 %v1315_v36 }
 0x169   : > { %v1094_v48 = vmax.f32 %v3114_v3, %v2398_v63  ;;  %v1004_v57 = vadd.f32 %v2731_v53, %v1003_v19  ;;  %v1317_v4 = vpop.f32.mrf.mxu1  ;;  %v2400_v49 = vpop.eup %2399 }
 0x16a   : > { %v1318_v1 = vadd.f32 %v2731_v53, %v1317_v4  ;;  %v2118_v51 = vpop.f32.mrf.mxu0 }
 0x16b   : > { %v1408_v7 = vmax.f32 %v1094_v48, %v2400_v49  ;;  %2413 = vtanh.f32 %v1004_v57  ;;  %v2174_v9 = vpop.f32.mrf.mxu1  ;;  %v3117_v49 = vmax.f32 %v2831_v59, %v2833_v61 }
 0x16c   : > { %v2402_v37 = vpop.eup %2401  ;;  %v1008_v30 = vpop.f32.mrf.mxu0  ;;  %2415 = vtanh.f32 %v1318_v1  ;;  %v3118_v9 = vmax.f32 %v2839_v8, %v2841_v11 }
 0x16d   : > { %v1866_v38 = vpack.c.bf16 %v1408_v7, %v1407_v58  ;;  %v1009_v17 = vadd.f32 %v2731_v53, %v1008_v30  ;;  %v1322_v20 = vpop.f32.mrf.mxu1  ;;  %v2404_v14 = vpop.eup %2403  ;;  %v1095_v55 = vmax.f32 %v3115_v52, %v2402_v37 }
 0x16e   : > { %v1323_v15 = vadd.f32 %v2731_v53, %v1322_v20  ;;  %v2121_v39 = vpop.f32.mrf.mxu0 }
 0x16f   : > { %1910 = vst [vmem:[%s2965_s27 + $0x18] sm:$0xff] %v1866_v38   ;;  %2417 = vtanh.f32 %v1009_v17  ;;  %v2177_v16 = vpop.f32.mrf.mxu1  ;;  %v1409_v45 = vmax.f32 %v1095_v55, %v2404_v14 }
 0x170   : > { %v2406_v18 = vpop.eup %2405  ;;  %v1011_v34 = vpop.f32.mrf.mxu0  ;;  %2419 = vtanh.f32 %v1323_v15 }
 0x171   : > { %v1096_v0 = vmax.f32 %v3116_v62, %v2406_v18  ;;  %v1012_v36 = vadd.f32 %v2731_v53, %v1011_v34  ;;  %v1325_v21 = vpop.f32.mrf.mxu1  ;;  %v2408_v25 = vpop.eup %2407  ;;  %v3119_v62 = vmax.f32 %v2847_v26, %v2849_v29 }
 0x172   : > { %v1326_v27 = vadd.f32 %v2731_v53, %v1325_v21  ;;  %v2122_v43 = vpop.f32.mrf.mxu0 }
 0x173   : > { %v1410_v31 = vmax.f32 %v1096_v0, %v2408_v25  ;;  %2421 = vtanh.f32 %v1012_v36  ;;  %v2178_v33 = vpop.f32.mrf.mxu1 }
 0x174   : > { %v2410_v63 = vpop.eup %2409  ;;  %v1016_v19 = vpop.f32.mrf.mxu0  ;;  %2423 = vtanh.f32 %v1326_v27  ;;  %v3120_v27 = vmax.f32 %v2855_v46, %v2857_v50 }
 0x175   : > { %v1871_v3 = vpack.c.bf16 %v1410_v31, %v1409_v45  ;;  %v1017_v44 = vadd.f32 %v2731_v53, %v1016_v19  ;;  %v1330_v47 = vpop.f32.mrf.mxu1  ;;  %v2412_v4 = vpop.eup %2411  ;;  %v1097_v1 = vmax.f32 %v3117_v49, %v2410_v63 }
 0x176   : > { %v1331_v48 = vadd.f32 %v2731_v53, %v1330_v47  ;;  %v2125_v57 = vpop.f32.mrf.mxu0 }
 0x177   : > { %1911 = vst [vmem:[%s2965_s27 + $0x20] sm:$0xff] %v1871_v3   ;;  %2425 = vtanh.f32 %v1017_v44  ;;  %v2181_v51 = vpop.f32.mrf.mxu1  ;;  %v1411_v39 = vmax.f32 %v1097_v1, %v2412_v4  ;;  %v3121_v1 = vmax.f32 %v2863_v5, %v2865_v6 }
 0x178   : > { %v2414_v58 = vpop.eup %2413  ;;  %v1019_v7 = vpop.f32.mrf.mxu0  ;;  %2427 = vtanh.f32 %v1331_v48 }
 0x179   : > { %v1098_v37 = vmax.f32 %v3118_v9, %v2414_v58  ;;  %v1020_v30 = vadd.f32 %v2731_v53, %v1019_v7  ;;  %v1333_v38 = vpop.f32.mrf.mxu1  ;;  %v2416_v17 = vpop.eup %2415 }
 0x17a   : > { %v1334_v20 = vadd.f32 %v2731_v53, %v1333_v38  ;;  %v2126_v15 = vpop.f32.mrf.mxu0  ;;  %v3045_v38 = vld [vmem:[%s3097_s2] ss:$0 sm:$0xff] }
 0x17b   : > { %v1412_v59 = vmax.f32 %v1098_v37, %v2416_v17  ;;  %2429 = vtanh.f32 %v1020_v30  ;;  %v2182_v61 = vpop.f32.mrf.mxu1  ;;  %v3122_v37 = vmax.f32 %v2871_v28, %v2873_v35 }
 0x17c   : > { %v2418_v14 = vpop.eup %2417  ;;  %v1024_v52 = vpop.f32.mrf.mxu0  ;;  %2431 = vtanh.f32 %v1334_v20 }
 0x17d   : > { %v1876_v55 = vpack.c.bf16 %v1412_v59, %v1411_v39  ;;  %v1025_v8 = vadd.f32 %v2731_v53, %v1024_v52  ;;  %v1338_v11 = vpop.f32.mrf.mxu1  ;;  %v2420_v34 = vpop.eup %2419  ;;  %v1099_v0 = vmax.f32 %v3119_v62, %v2418_v14 }
 0x17e   : > { %v1339_v16 = vadd.f32 %v2731_v53, %v1338_v11  ;;  %v2129_v18 = vpop.f32.mrf.mxu0 }
 0x17f   : > { %1912 = vst [vmem:[%s2965_s27 + $0x28] sm:$0xff] %v1876_v55   ;;  %2433 = vtanh.f32 %v1025_v8  ;;  %v2185_v36 = vpop.f32.mrf.mxu1  ;;  %v1413_v3 = vmax.f32 %v1099_v0, %v2420_v34 }
 0x180   : > { %v2422_v21 = vpop.eup %2421  ;;  %v1027_v25 = vpop.f32.mrf.mxu0  ;;  %2435 = vtanh.f32 %v1339_v16  ;;  %v3123_v16 = vmax.f32 %v2879_v60, %v2881_v2  ;;  %v3124_v36 = vmax.f32 %v2887_v32, %v2889_v41 }
 0x181   : > { %v1100_v43 = vmax.f32 %v3120_v27, %v2422_v21  ;;  %v1028_v45 = vadd.f32 %v2731_v53, %v1027_v25  ;;  %v1341_v31 = vpop.f32.mrf.mxu1  ;;  %v2424_v33 = vpop.eup %2423 }
 0x182   : > { %v1342_v63 = vadd.f32 %v2731_v53, %v1341_v31  ;;  %v2130_v19 = vpop.f32.mrf.mxu0 }
 0x183   : > { %v1414_v26 = vmax.f32 %v1100_v43, %v2424_v33  ;;  %2437 = vtanh.f32 %v1028_v45  ;;  %v2186_v29 = vpop.f32.mrf.mxu1 }
 0x184   : > { %v2426_v44 = vpop.eup %2425  ;;  %v1032_v47 = vpop.f32.mrf.mxu0  ;;  %2439 = vtanh.f32 %v1342_v63 }
 0x185   : > { %v1881_v48 = vpack.c.bf16 %v1414_v26, %v1413_v3  ;;  %v1033_v46 = vadd.f32 %v2731_v53, %v1032_v47  ;;  %v1346_v50 = vpop.f32.mrf.mxu1  ;;  %v2428_v49 = vpop.eup %2427  ;;  %v1101_v51 = vmax.f32 %v3121_v1, %v2426_v44  ;;  %v3125_v47 = vmax.f32 %v2895_v22, %v2897_v23 }
 0x186   : > { %v1347_v57 = vadd.f32 %v2731_v53, %v1346_v50  ;;  %v2133_v4 = vpop.f32.mrf.mxu0 }
 0x187   : > { %1913 = vst [vmem:[%s2965_s27 + $0x30] sm:$0xff] %v1881_v48   ;;  %2441 = vtanh.f32 %v1033_v46  ;;  %v2189_v58 = vpop.f32.mrf.mxu1  ;;  %v1415_v15 = vmax.f32 %v1101_v51, %v2428_v49  ;;  %v3126_v4 = vmax.f32 %v2903_v13, %v2905_v10 }
 0x188   : > { %v2430_v7 = vpop.eup %2429  ;;  %v1035_v9 = vpop.f32.mrf.mxu0  ;;  %2443 = vtanh.f32 %v1347_v57 }
 0x189   : > { %v1102_v30 = vmax.f32 %v3122_v37, %v2430_v7  ;;  %v1036_v53 = vadd.f32 %v3045_v38, %v1035_v9  ;;  %v1349_v17 = vpop.f32.mrf.mxu1  ;;  %v2432_v20 = vpop.eup %2431 }
 0x18a   : > { %v1350_v5 = vadd.f32 %v3045_v38, %v1349_v17  ;;  %v2134_v6 = vpop.f32.mrf.mxu0 }
 0x18b   : > { %v1416_v39 = vmax.f32 %v1102_v30, %v2432_v20  ;;  %2445 = vtanh.f32 %v1036_v53  ;;  %v2190_v59 = vpop.f32.mrf.mxu1 }
 0x18c   : > { %v2434_v28 = vpop.eup %2433  ;;  %v1040_v35 = vpop.f32.mrf.mxu0  ;;  %2447 = vtanh.f32 %v1350_v5 }
 0x18d   : > { %v1886_v61 = vpack.c.bf16 %v1416_v39, %v1415_v15  ;;  %v1041_v14 = vadd.f32 %v3045_v38, %v1040_v35  ;;  %v1354_v52 = vpop.f32.mrf.mxu1  ;;  %v2436_v11 = vpop.eup %2435  ;;  %v1103_v18 = vmax.f32 %v3123_v16, %v2434_v28  ;;  %v3127_v15 = vmax.f32 %v2911_v56, %v2913_v54 }
 0x18e   : > { %v1355_v55 = vadd.f32 %v3045_v38, %v1354_v52  ;;  %v2137_v8 = vpop.f32.mrf.mxu0 }
 0x18f   : > { %1914 = vst [vmem:[%s2965_s27 + $0x38] sm:$0xff] %v1886_v61   ;;  %2449 = vtanh.f32 %v1041_v14  ;;  %v2193_v34 = vpop.f32.mrf.mxu1  ;;  %v1417_v33 = vmax.f32 %v1103_v18, %v2436_v11  ;;  %v3128_v61 = vmax.f32 %v2919_v40, %v2921_v42  ;;  %v3131_v40 = vld [vmem:[#allocation3_spill] sm:$0xff] }
 0x190   : > { %v2438_v62 = vpop.eup %2437  ;;  %v1043_v0 = vpop.f32.mrf.mxu0  ;;  %2451 = vtanh.f32 %v1355_v55  ;;  %v3129_v34 = vmax.f32 %v2925_v24, %v2927_v12 }
 0x191   : > { %v1104_v21 = vmax.f32 %v3124_v36, %v2438_v62  ;;  %v1044_v25 = vadd.f32 %v3045_v38, %v1043_v0  ;;  %v1357_v27 = vpop.f32.mrf.mxu1  ;;  %v2440_v43 = vpop.eup %2439  ;;  %v3130_v36 = vld [vmem:[#allocation2_spill] sm:$0xff] }
 0x192   : > { %v1358_v45 = vadd.f32 %v3045_v38, %v1357_v27  ;;  %v2138_v31 = vpop.f32.mrf.mxu0  ;;  %v3132_v42 = vmax.f32 %v3130_v36, %v3131_v40 }
 0x193   : > { %v1418_v60 = vmax.f32 %v1104_v21, %v2440_v43  ;;  %2453 = vtanh.f32 %v1044_v25  ;;  %v2194_v2 = vpop.f32.mrf.mxu1 }
 0x194   : > { %v2442_v63 = vpop.eup %2441  ;;  %v1048_v19 = vpop.f32.mrf.mxu0  ;;  %2455 = vtanh.f32 %v1358_v45  ;;  %v3134_v2 = vld [vmem:[#allocation5_spill] sm:$0xff] }
 0x195   : > { %v1891_v3 = vpack.c.bf16 %v1418_v60, %v1417_v33  ;;  %v1049_v32 = vadd.f32 %v3045_v38, %v1048_v19  ;;  %v1362_v41 = vpop.f32.mrf.mxu1  ;;  %v2444_v44 = vpop.eup %2443  ;;  %v1105_v48 = vmax.f32 %v3125_v47, %v2442_v63  ;;  %v3133_v60 = vld [vmem:[#allocation4_spill] sm:$0xff] }
 0x196   : > { %v1363_v26 = vadd.f32 %v3045_v38, %v1362_v41  ;;  %v2141_v29 = vpop.f32.mrf.mxu0  ;;  %v3135_v63 = vmax.f32 %v3133_v60, %v3134_v2 }
 0x197   : > { %1915 = vst [vmem:[%s2965_s27 + $0x40] sm:$0xff] %v1891_v3   ;;  %2457 = vtanh.f32 %v1049_v32  ;;  %v2197_v46 = vpop.f32.mrf.mxu1  ;;  %v1419_v37 = vmax.f32 %v1105_v48, %v2444_v44 }
 0x198   : > { %v2446_v50 = vpop.eup %2445  ;;  %v1051_v57 = vpop.f32.mrf.mxu0  ;;  %2459 = vtanh.f32 %v1363_v26 }
 0x199   : > { %v1106_v49 = vmax.f32 %v3126_v4, %v2446_v50  ;;  %v1052_v1 = vadd.f32 %v3045_v38, %v1051_v57  ;;  %v1365_v51 = vpop.f32.mrf.mxu1  ;;  %v2448_v58 = vpop.eup %2447 }
 0x19a   : > { %v1366_v7 = vadd.f32 %v3045_v38, %v1365_v51  ;;  %v2142_v9 = vpop.f32.mrf.mxu0 }
 0x19b   : > { %v1420_v22 = vmax.f32 %v1106_v49, %v2448_v58  ;;  %2461 = vtanh.f32 %v1052_v1  ;;  %v2198_v23 = vpop.f32.mrf.mxu1 }
 0x19c   : > { %v2450_v30 = vpop.eup %2449  ;;  %v1056_v53 = vpop.f32.mrf.mxu0  ;;  %2463 = vtanh.f32 %v1366_v7 }
 0x19d   : > { %v1896_v17 = vpack.c.bf16 %v1420_v22, %v1419_v37  ;;  %v1057_v13 = vadd.f32 %v3045_v38, %v1056_v53  ;;  %v1370_v10 = vpop.f32.mrf.mxu1  ;;  %v2452_v6 = vpop.eup %2451  ;;  %v1107_v39 = vmax.f32 %v3127_v15, %v2450_v30 }
 0x19e   : > { %v1371_v20 = vadd.f32 %v3045_v38, %v1370_v10  ;;  %v2145_v5 = vpop.f32.mrf.mxu0 }
 0x19f   : > { %1916 = vst [vmem:[%s2965_s27 + $0x48] sm:$0xff] %v1896_v17   ;;  %2465 = vtanh.f32 %v1057_v13  ;;  %v2201_v59 = vpop.f32.mrf.mxu1  ;;  %v1421_v8 = vmax.f32 %v1107_v39, %v2452_v6 }
 0x1a0   : > { %v2454_v28 = vpop.eup %2453  ;;  %2467 = vtanh.f32 %v1371_v20  ;;  %v1059_v35 = vpop.f32.mrf.mxu0 }
 0x1a1   : > { %v1108_v14 = vmax.f32 %v3128_v61, %v2454_v28  ;;  %v1373_v52 = vpop.f32.mrf.mxu1  ;;  %v2456_v55 = vpop.eup %2455 }
 0x1a2   : > { %v2146_v38 = vpop.f32.mrf.mxu0 }
 0x1a3   : > { %v1422_v11 = vmax.f32 %v1108_v14, %v2456_v55  ;;  %v2202_v16 = vpop.f32.mrf.mxu1 }
 0x1a4   : > { %v2458_v18 = vpop.eup %2457 }
 0x1a5   : > { %v1901_v56 = vpack.c.bf16 %v1422_v11, %v1421_v8  ;;  %v2460_v54 = vpop.eup %2459  ;;  %v1109_v62 = vmax.f32 %v3129_v34, %v2458_v18 }
 0x1a7   : > { %1917 = vst [vmem:[%s2965_s27 + $0x50] sm:$0xff] %v1901_v56   ;;  %v1423_v27 = vmax.f32 %v1109_v62, %v2460_v54 }
 0x1a8   : > { %v2462_v0 = vpop.eup %2461 }
 0x1a9   : > { %v1110_v21 = vmax.f32 %v3132_v42, %v2462_v0  ;;  %v2464_v25 = vpop.eup %2463 }
 0x1ab   : > { %v1424_v43 = vmax.f32 %v1110_v21, %v2464_v25 }
 0x1ac   : > { %v2466_v45 = vpop.eup %2465 }
 0x1ad   : > { %v2468_v31 = vpop.eup %2467  ;;  %v1906_v33 = vpack.c.bf16 %v1424_v43, %v1423_v27  ;;  %v1111_v19 = vmax.f32 %v3135_v63, %v2466_v45 }
 0x1af   : > { %1918 = vst [vmem:[%s2965_s27 + $0x58] sm:$0xff] %v1906_v33   ;;  %v1425_v3 = vmax.f32 %v1111_v19, %v2468_v31 }
 0x1b1   : > { %v1847_v32 = vpack.c.bf16 %v1425_v3, %v1425_v3 }
 0x1b3   : > { %1551 = vst [vmem:[%s2965_s27 + $0x60] sm:$0x3] %v1847_v32 }
 0x1b4 PF: > { %s13_s12 = sadd.s32 1, %s2476_s12  }
 0x1b5   : > { %p10_p4 = scmp.ge.s32.totalorder %s13_s12, 4  }
 0x1b7   :  { %12 = sbr.rel (!%p10_p4) target bundleno = 1 (0x1), region = 65 }

// kernel: lenet_forward.4
= control target key start
LH: loop header
LB: loop body
LE: loop exit
PB: predicated region body
PF: predicated region fallthrough
CT: control target
= control target key end

     0   :  { %s886_s12 = smov 0   ;;  %s1105_s0 = inlined_call_operand.vmem [shape: bf16[2,4,25,200], index: 0, kind: input, shape index: {}]   ;;  %s1106_s1 = inlined_call_operand.vmem [shape: bf16[200,128], index: 1, kind: input, shape index: {}]   ;;  %s1107_s2 = inlined_call_operand.vmem [shape: f32[1,128], index: 2, kind: input, shape index: {}]   ;;  %s1108_s3 = inlined_call_operand.vmem [shape: bf16[2,25,128], index: 3, kind: output, shape index: {}]  }
   0x1 LB: > { %s703_s13 = sadd.s32 4294967295, %s863_s12   ;;  %p707_p0 = scmp.ge.s32.totalorder %s863_s12, 1  ;;  %s863_s12 = sphi %s886_s12, %s13_s12  }
   0x2   : > { %p137_p1 = scmp.lt.s32.totalorder %s863_s12, 3 }
   0x4   : > { %p138_p2 = pnand %p707_p0, %p137_p1 }
   0x5   : > { %p161_p3 = scmp.lt.s32.totalorder (!%p138_p2), %s703_s13, 1 }
   0x6   : > { %141 = sbr.rel (%p138_p2) target bundleno = 345 (0x159), region = 32 }
   0xb   : > { %v897_v0 = vld [vmem:[%s1106_s1 + $0x38] sm:$0xff]   ;;  %v865_v1 = vmov 0   ;;  %v906_v2 = vld [vmem:[%s1106_s1 + $0x30] sm:$0xff]   ;;  %s1110_s13 = smov (!%p161_p3, %s703_s13), 1  ;;  %v917_v3 = vld [vmem:[%s1106_s1 + $0x28] sm:$0xff]   ;;  %vm301_vm0 = vcmask 588800  }
   0xc   : > { %312 = vmatprep.subr.bf16.mxu0 %v865_v1  ;;  %394 = vmatprep.subr.bf16.mxu1 %v865_v1  ;;  %s768_s20 = sshll.u32 %s1110_s13, 7  ;;  %v927_v4 = vld [vmem:[%s1106_s1 + $0x20] sm:$0xff]   ;;  %v942_v6 = vld [vmem:[%s1106_s1 + $0x18] sm:$0xff]   ;;  %v954_v8 = vld [vmem:[%s1106_s1 + $0x10] sm:$0xff]   ;;  %vm308_vm1 = vcmask 1043456   ;;  %s769_s21 = sshll.u32 %s1110_s13, 4 }
   0xd   : > { %313 = vmatpush1.bf16.msra.mxu0 %v897_v0  ;;  %395 = vmatpush1.bf16.msra.mxu1 %v897_v0  ;;  %s932_s25 = scalar_lea.vmem %s1105_s0, %s768_s20  ;;  %v963_v9 = vld [vmem:[%s1106_s1 + $0x8] sm:$0xff]   ;;  %v972_v10 = vld [vmem:[%s1106_s1] sm:$0xff]   ;;  %v990_v13 = vld [vmem:[%s1106_s1 + $0x58] sm:$0xff]   ;;  %s170_s24 = scalar_lea.vmem %s1108_s3, %s769_s21  ;;  %vm642_vm2 = vcmask 1040384   ;;  %vm643_vm3 = vsmask.f32 256 }
   0xe   : > { %314 = vmatprep.subr.bf16.mxu0 %v865_v1  ;;  %396 = vmatprep.subr.bf16.mxu1 %v865_v1  ;;  %v803_v5 = vld [vmem:[%s932_s25 + $0x4] ss:$8 sps:$4 sm:$0xff]   ;;  %v796_v11 = vld [vmem:[%s1106_s1 + $0x60] ss:$0 sps:$4 sm:$0xff]   ;;  %v999_v14 = vld [vmem:[%s1106_s1 + $0x50] sm:$0xff]  }
   0xf   : > { %v806_v7 = vld [vmem:[%s932_s25 + $0x24] ss:$8 sps:$4 sm:$0xff]   ;;  %730 = vmatprep.mubr.msk.bf16.mxu0 %vm301_vm0, %v803_v5  ;;  %v983_v12 = vsel %vm308_vm1, %v796_v11, 0  ;;  %v801_v17 = vld [vmem:[%s932_s25] ss:$8 sps:$4 sm:$0xff]   ;;  %vm644_vm4 = vmand %vm642_vm2, %vm643_vm3 }
  0x10   : > { %740 = vmatprep.mubr.msk.bf16.mxu1 %vm301_vm0, %v806_v7  ;;  %v1008_v15 = vld [vmem:[%s1106_s1 + $0x48] sm:$0xff]   ;;  %v1017_v16 = vld [vmem:[%s1106_s1 + $0x40] sm:$0xff]   ;;  %v807_v19 = vld [vmem:[%s932_s25 + $0x14] ss:$8 sps:$4 sm:$0x1f]  }
  0x11   : > { %315 = vmatpush1.bf16.msra.mxu0 %v906_v2  ;;  %397 = vmatpush1.bf16.msra.mxu1 %v906_v2  ;;  %v804_v18 = vld [vmem:[%s932_s25 + $0x20] ss:$8 sps:$4 sm:$0xff]   ;;  %v810_v20 = vld [vmem:[%s932_s25 + $0x34] ss:$8 sps:$4 sm:$0x1f]  }
  0x12   : > { %316 = vmatprep.subr.bf16.mxu0 %v865_v1  ;;  %398 = vmatprep.subr.bf16.mxu1 %v865_v1  ;;  %v809_v21 = vld [vmem:[%s932_s25 + $0x10] ss:$8 sps:$4 sm:$0x1f]   ;;  %v815_v23 = vld [vmem:[%s932_s25 + $0x44] ss:$8 sps:$4 sm:$0xff]  }
  0x13   : > { %v812_v22 = vld [vmem:[%s932_s25 + $0x30] ss:$8 sps:$4 sm:$0x1f]   ;;  %v818_v24 = vld [vmem:[%s932_s25 + $0x64] ss:$8 sps:$4 sm:$0xff]  }
  0x14   : > { %v813_v25 = vld [vmem:[%s932_s25 + $0x40] ss:$8 sps:$4 sm:$0xff]   ;;  %v819_v27 = vld [vmem:[%s932_s25 + $0x54] ss:$8 sps:$4 sm:$0x1f]  }
  0x15   : > { %317 = vmatpush1.bf16.msra.mxu0 %v917_v3  ;;  %399 = vmatpush1.bf16.msra.mxu1 %v917_v3  ;;  %v816_v26 = vld [vmem:[%s932_s25 + $0x60] ss:$8 sps:$4 sm:$0xff]   ;;  %v821_v28 = vld [vmem:[%s932_s25 + $0x74] ss:$8 sps:$4 sm:$0x1f]  }
  0x16   : > { %318 = vmatprep.subr.bf16.mxu0 %v865_v1  ;;  %400 = vmatprep.subr.bf16.mxu1 %v865_v1  ;;  %v823_v29 = vld [vmem:[%s932_s25 + $0x50] ss:$8 sps:$4 sm:$0x1f]   ;;  %v712_v47 = vld [vmem:[%s1107_s2] ss:$0 sm:$0xff] }
  0x17   : > { %v824_v30 = vld [vmem:[%s932_s25 + $0x70] ss:$8 sps:$4 sm:$0x1f]  }
  0x19   : > { %319 = vmatpush1.bf16.msra.mxu0 %v927_v4  ;;  %401 = vmatpush1.bf16.msra.mxu1 %v927_v4 }
  0x1a   : > { %320 = vmatprep.subr.bf16.mxu0 %v865_v1  ;;  %402 = vmatprep.subr.bf16.mxu1 %v865_v1 }
  0x1d   : > { %321 = vmatpush1.bf16.msra.mxu0 %v942_v6  ;;  %403 = vmatpush1.bf16.msra.mxu1 %v942_v6 }
  0x1e   : > { %322 = vmatprep.subr.bf16.mxu0 %v865_v1  ;;  %404 = vmatprep.subr.bf16.mxu1 %v865_v1 }
  0x21   : > { %323 = vmatpush1.bf16.msra.mxu0 %v954_v8  ;;  %405 = vmatpush1.bf16.msra.mxu1 %v954_v8 }
  0x22   : > { %324 = vmatprep.subr.bf16.mxu0 %v865_v1  ;;  %406 = vmatprep.subr.bf16.mxu1 %v865_v1 }
  0x25   : > { %325 = vmatpush1.bf16.msra.mxu0 %v963_v9  ;;  %407 = vmatpush1.bf16.msra.mxu1 %v963_v9 }
  0x26   : > { %326 = vmatprep.subr.bf16.mxu0 %v865_v1  ;;  %408 = vmatprep.subr.bf16.mxu1 %v865_v1 }
  0x29   : > { %327 = vmatpush1.bf16.msra.mxu0 %v972_v10  ;;  %409 = vmatpush1.bf16.msra.mxu1 %v972_v10 }
  0x2a   : > { %334 = vmatprep.subr.bf16.mxu0 %v865_v1  ;;  %416 = vmatprep.subr.bf16.mxu1 %v865_v1 }
  0x2d   : > { %335 = vmatpush2.bf16.msra.mxu0 %v983_v12  ;;  %417 = vmatpush2.bf16.msra.mxu1 %v983_v12 }
  0x2e   : > { %336 = vmatprep.subr.bf16.mxu0 %v865_v1  ;;  %418 = vmatprep.subr.bf16.mxu1 %v865_v1 }
  0x31   : > { %337 = vmatpush2.bf16.msra.mxu0 %v990_v13  ;;  %419 = vmatpush2.bf16.msra.mxu1 %v990_v13 }
  0x32   : > { %338 = vmatprep.subr.bf16.mxu0 %v865_v1  ;;  %420 = vmatprep.subr.bf16.mxu1 %v865_v1 }
  0x35   : > { %339 = vmatpush2.bf16.msra.mxu0 %v999_v14  ;;  %421 = vmatpush2.bf16.msra.mxu1 %v999_v14 }
  0x36   : > { %340 = vmatprep.subr.bf16.mxu0 %v865_v1  ;;  %422 = vmatprep.subr.bf16.mxu1 %v865_v1 }
  0x39   : > { %341 = vmatpush2.bf16.msra.mxu0 %v1008_v15  ;;  %423 = vmatpush2.bf16.msra.mxu1 %v1008_v15 }
  0x3a   : > { %342 = vmatprep.subr.bf16.mxu0 %v865_v1  ;;  %424 = vmatprep.subr.bf16.mxu1 %v865_v1 }
  0x3d   : > { %343 = vmatpush2.bf16.msra.mxu0 %v1017_v16  ;;  %425 = vmatpush2.bf16.msra.mxu1 %v1017_v16 }
  0x3e   : > { %480 = vmatprep.subr.bf16.mxu0 %v865_v1  ;;  %566 = vmatprep.subr.bf16.mxu1 %v865_v1 }
  0x40   : > { %345 = vmatmul.mubr.bf16.vlgmr.msra.gmra.mxu0 %v801_v17  ;;  %427 = vmatmul.mubr.bf16.vlgmr.msra.gmra.mxu1 %v804_v18 }
  0x41   : > { %481 = vmatpush1.bf16.msra.mxu0 %v897_v0  ;;  %567 = vmatpush1.bf16.msra.mxu1 %v897_v0 }
  0x42   : > { %482 = vmatprep.subr.bf16.mxu0 %v865_v1  ;;  %568 = vmatprep.subr.bf16.mxu1 %v865_v1 }
  0x43   : > { %731 = vmatprep.mubr.msk.bf16.mxu0 %vm301_vm0, %v807_v19  ;;  %741 = vmatprep.mubr.msk.bf16.mxu1 %vm301_vm0, %v810_v20 }
  0x45   : > { %483 = vmatpush1.bf16.msra.mxu0 %v906_v2  ;;  %569 = vmatpush1.bf16.msra.mxu1 %v906_v2 }
  0x46   : > { %484 = vmatprep.subr.bf16.mxu0 %v865_v1  ;;  %570 = vmatprep.subr.bf16.mxu1 %v865_v1 }
  0x48   : > { %353 = vmatmul.mubr.bf16.gmra.mxu0 %v809_v21  ;;  %435 = vmatmul.mubr.bf16.gmra.mxu1 %v812_v22 }
  0x49   : > { %485 = vmatpush1.bf16.msra.mxu0 %v917_v3  ;;  %571 = vmatpush1.bf16.msra.mxu1 %v917_v3 }
  0x4a   : > { %486 = vmatprep.subr.bf16.mxu0 %v865_v1  ;;  %572 = vmatprep.subr.bf16.mxu1 %v865_v1 }
  0x4b   : > { %750 = vmatprep.mubr.msk.bf16.mxu0 %vm301_vm0, %v815_v23  ;;  %760 = vmatprep.mubr.msk.bf16.mxu1 %vm301_vm0, %v818_v24 }
  0x4d   : > { %487 = vmatpush1.bf16.msra.mxu0 %v927_v4  ;;  %573 = vmatpush1.bf16.msra.mxu1 %v927_v4 }
  0x4e   : > { %488 = vmatprep.subr.bf16.mxu0 %v865_v1  ;;  %574 = vmatprep.subr.bf16.mxu1 %v865_v1 }
  0x51   : > { %489 = vmatpush1.bf16.msra.mxu0 %v942_v6  ;;  %575 = vmatpush1.bf16.msra.mxu1 %v942_v6 }
  0x52   : > { %490 = vmatprep.subr.bf16.mxu0 %v865_v1  ;;  %576 = vmatprep.subr.bf16.mxu1 %v865_v1 }
  0x55   : > { %491 = vmatpush1.bf16.msra.mxu0 %v954_v8  ;;  %577 = vmatpush1.bf16.msra.mxu1 %v954_v8 }
  0x56   : > { %492 = vmatprep.subr.bf16.mxu0 %v865_v1  ;;  %578 = vmatprep.subr.bf16.mxu1 %v865_v1 }
  0x59   : > { %493 = vmatpush1.bf16.msra.mxu0 %v963_v9  ;;  %579 = vmatpush1.bf16.msra.mxu1 %v963_v9 }
  0x5a   : > { %494 = vmatprep.subr.bf16.mxu0 %v865_v1  ;;  %580 = vmatprep.subr.bf16.mxu1 %v865_v1 }
  0x5d   : > { %495 = vmatpush1.bf16.msra.mxu0 %v972_v10  ;;  %581 = vmatpush1.bf16.msra.mxu1 %v972_v10 }
  0x5e   : > { %502 = vmatprep.subr.bf16.mxu0 %v865_v1  ;;  %588 = vmatprep.subr.bf16.mxu1 %v865_v1 }
  0x61   : > { %503 = vmatpush2.bf16.msra.mxu0 %v983_v12  ;;  %589 = vmatpush2.bf16.msra.mxu1 %v983_v12 }
  0x62   : > { %504 = vmatprep.subr.bf16.mxu0 %v865_v1  ;;  %590 = vmatprep.subr.bf16.mxu1 %v865_v1 }
  0x65   : > { %505 = vmatpush2.bf16.msra.mxu0 %v990_v13  ;;  %591 = vmatpush2.bf16.msra.mxu1 %v990_v13 }
  0x66   : > { %506 = vmatprep.subr.bf16.mxu0 %v865_v1  ;;  %592 = vmatprep.subr.bf16.mxu1 %v865_v1 }
  0x69   : > { %507 = vmatpush2.bf16.msra.mxu0 %v999_v14  ;;  %593 = vmatpush2.bf16.msra.mxu1 %v999_v14 }
  0x6a   : > { %508 = vmatprep.subr.bf16.mxu0 %v865_v1  ;;  %594 = vmatprep.subr.bf16.mxu1 %v865_v1 }
  0x6d   : > { %509 = vmatpush2.bf16.msra.mxu0 %v1008_v15  ;;  %595 = vmatpush2.bf16.msra.mxu1 %v1008_v15 }
  0x6e   : > { %510 = vmatprep.subr.bf16.mxu0 %v865_v1  ;;  %596 = vmatprep.subr.bf16.mxu1 %v865_v1 }
  0x71   : > { %511 = vmatpush2.bf16.msra.mxu0 %v1017_v16  ;;  %597 = vmatpush2.bf16.msra.mxu1 %v1017_v16 }
  0x74   : > { %513 = vmatmul.mubr.bf16.vlgmr.msra.gmra.mxu0 %v813_v25  ;;  %599 = vmatmul.mubr.bf16.vlgmr.msra.gmra.mxu1 %v816_v26 }
  0x75   : > { %751 = vmatprep.mubr.msk.bf16.mxu0 %vm301_vm0, %v819_v27  ;;  %761 = vmatprep.mubr.msk.bf16.mxu1 %vm301_vm0, %v821_v28 }
  0x7c   : > { %521 = vmatmul.mubr.bf16.gmra.mxu0 %v823_v29  ;;  %607 = vmatmul.mubr.bf16.gmra.mxu1 %v824_v30 }
 0x100   : > { %v346_v31 = vpop.f32.mrf.mxu0  ;;  %v428_v32 = vpop.f32.mrf.mxu1 }
 0x101   : > { %v347_v48 = vadd.f32 %v712_v47, %v346_v31  ;;  %v429_v49 = vadd.f32 %v712_v47, %v428_v32 }
 0x102   : > { %v348_v33 = vpop.f32.mrf.mxu0  ;;  %v430_v34 = vpop.f32.mrf.mxu1 }
 0x103   : > { %825 = vtanh.f32 %v347_v48 }
 0x104   : > { %v349_v35 = vpop.f32.mrf.mxu0  ;;  %v431_v36 = vpop.f32.mrf.mxu1  ;;  %827 = vtanh.f32 %v429_v49 }
 0x105   : > { %v350_v50 = vadd.f32 %v712_v47, %v349_v35  ;;  %v432_v51 = vadd.f32 %v712_v47, %v431_v36 }
 0x106   : > { %v351_v37 = vpop.f32.mrf.mxu0  ;;  %v433_v38 = vpop.f32.mrf.mxu1 }
 0x107   : > { %829 = vtanh.f32 %v350_v50 }
 0x108   : > { %v354_v39 = vpop.f32.mrf.mxu0  ;;  %v436_v40 = vpop.f32.mrf.mxu1  ;;  %831 = vtanh.f32 %v432_v51 }
 0x109   : > { %v355_v52 = vadd.f32 %v712_v47, %v354_v39  ;;  %v437_v55 = vadd.f32 %v712_v47, %v436_v40 }
 0x10a   : > { %v356_v41 = vpop.f32.mrf.mxu0  ;;  %v438_v42 = vpop.f32.mrf.mxu1 }
 0x10c   : > { %v357_v43 = vpop.f32.mrf.mxu0  ;;  %v439_v44 = vpop.f32.mrf.mxu1 }
 0x10d   : > { %v358_v60 = vadd.f32 %v712_v47, %v357_v43  ;;  %v440_v1 = vadd.f32 %v712_v47, %v439_v44 }
 0x10e   : > { %v359_v45 = vpop.f32.mrf.mxu0  ;;  %v441_v46 = vpop.f32.mrf.mxu1 }
 0x10f   : > { %v645_v46 = vld [vmem:[%s170_s24 + $0xc] sm:$0x1] }
 0x110   : > { %v826_v10 = vpop.eup %825 }
 0x111   : > { %v828_v13 = vpop.eup %827 }
 0x112   : > { %v447_v22 = vmax.f32 %v826_v10, %v828_v13 }
 0x114   : > { %v830_v16 = vpop.eup %829 }
 0x115   : > { %v832_v19 = vpop.eup %831 }
 0x116   : > { %v448_v25 = vmax.f32 %v830_v16, %v832_v19 }
 0x134   : > { %v514_v53 = vpop.f32.mrf.mxu0  ;;  %v600_v54 = vpop.f32.mrf.mxu1 }
 0x135   : > { %v515_v56 = vadd.f32 %v712_v47, %v514_v53  ;;  %v601_v57 = vadd.f32 %v712_v47, %v600_v54 }
 0x136   : > { %v516_v58 = vpop.f32.mrf.mxu0  ;;  %v602_v59 = vpop.f32.mrf.mxu1 }
 0x137   : > { %833 = vtanh.f32 %v515_v56 }
 0x138   : > { %835 = vtanh.f32 %v355_v52  ;;  %v517_v61 = vpop.f32.mrf.mxu0  ;;  %v603_v62 = vpop.f32.mrf.mxu1 }
 0x139   : > { %837 = vtanh.f32 %v437_v55  ;;  %v518_v63 = vadd.f32 %v712_v47, %v517_v61  ;;  %v604_v0 = vadd.f32 %v712_v47, %v603_v62 }
 0x13a   : > { %839 = vtanh.f32 %v601_v57  ;;  %v519_v2 = vpop.f32.mrf.mxu0  ;;  %v605_v3 = vpop.f32.mrf.mxu1 }
 0x13b   : > { %841 = vtanh.f32 %v518_v63 }
 0x13c   : > { %843 = vtanh.f32 %v358_v60  ;;  %v522_v4 = vpop.f32.mrf.mxu0  ;;  %v608_v5 = vpop.f32.mrf.mxu1 }
 0x13d   : > { %845 = vtanh.f32 %v604_v0  ;;  %v523_v6 = vadd.f32 %v712_v47, %v522_v4  ;;  %v609_v7 = vadd.f32 %v712_v47, %v608_v5 }
 0x13e   : > { %847 = vtanh.f32 %v440_v1  ;;  %v524_v8 = vpop.f32.mrf.mxu0  ;;  %v610_v9 = vpop.f32.mrf.mxu1 }
 0x13f   : > { %849 = vtanh.f32 %v523_v6 }
 0x140   : > { %851 = vtanh.f32 %v609_v7  ;;  %v525_v11 = vpop.f32.mrf.mxu0  ;;  %v611_v12 = vpop.f32.mrf.mxu1 }
 0x141   : > { %v526_v14 = vadd.f32 %v712_v47, %v525_v11  ;;  %v612_v15 = vadd.f32 %v712_v47, %v611_v12 }
 0x142   : > { %v527_v17 = vpop.f32.mrf.mxu0  ;;  %v613_v18 = vpop.f32.mrf.mxu1 }
 0x143   : > { %853 = vtanh.f32 %v526_v14 }
 0x144   : > { %v834_v20 = vpop.eup %833  ;;  %855 = vtanh.f32 %v612_v15 }
 0x145   : > { %v836_v21 = vpop.eup %835  ;;  %v533_v26 = vmax.f32 %v447_v22, %v834_v20 }
 0x146   : > { %v838_v23 = vpop.eup %837 }
 0x147   : > { %v840_v24 = vpop.eup %839  ;;  %v449_v32 = vmax.f32 %v836_v21, %v838_v23 }
 0x148   : > { %v842_v27 = vpop.eup %841  ;;  %v619_v33 = vmax.f32 %v533_v26, %v840_v24 }
 0x149   : > { %v844_v28 = vpop.eup %843  ;;  %v534_v29 = vmax.f32 %v448_v25, %v842_v27 }
 0x14a   : > { %v846_v30 = vpop.eup %845 }
 0x14b   : > { %v848_v31 = vpop.eup %847  ;;  %v620_v34 = vmax.f32 %v534_v29, %v846_v30 }
 0x14c   : > { %v850_v35 = vpop.eup %849  ;;  %v450_v39 = vmax.f32 %v844_v28, %v848_v31 }
 0x14d   : > { %v852_v36 = vpop.eup %851  ;;  %v777_v37 = vpack.c.bf16 %v620_v34, %v619_v33  ;;  %v535_v38 = vmax.f32 %v449_v32, %v850_v35 }
 0x14f   : > { %778 = vst [vmem:[%s170_s24] sm:$0xff] %v777_v37   ;;  %v621_v40 = vmax.f32 %v535_v38, %v852_v36 }
 0x150   : > { %v854_v41 = vpop.eup %853 }
 0x151   : > { %v772_v42 = vpack.c.bf16 %v621_v40, %v621_v40  ;;  %v536_v43 = vmax.f32 %v450_v39, %v854_v41  ;;  %v856_v44 = vpop.eup %855 }
 0x153   : > { %641 = vst [vmem:[%s170_s24 + $0x8] sm:$0xf] %v772_v42  ;;  %v622_v45 = vmax.f32 %v536_v43, %v856_v44 }
 0x155   : > { %v773_v47 = vpack.c.bf16 %v622_v45, %v622_v45 }
 0x157   : > { %v646_v48 = vsel %vm644_vm4, %v773_v47, %v645_v46 }
 0x158   : > { %647 = vst [vmem:[%s170_s24 + $0xc] sm:$0x1] %v646_v48 }
 0x159 PF: > { %s13_s12 = sadd.s32 1, %s863_s12  }
 0x15a   : > { %p10_p4 = scmp.ge.s32.totalorder %s13_s12, 4  }
 0x15c   :  { %12 = sbr.rel (!%p10_p4) target bundleno = 1 (0x1), region = 65 }

// kernel: lenet_forward.5
= control target key start
LH: loop header
LB: loop body
LE: loop exit
PB: predicated region body
PF: predicated region fallthrough
CT: control target
= control target key end

     0   :  { %12 = vsyncpa [#allocation3], 0  ;;  %s1456_s0 = inlined_call_operand.vmem [shape: bf16[2,1,400], index: 0, kind: input, shape index: {}]   ;;  %s1457_s1 = inlined_call_operand.vmem [shape: bf16[400,128], index: 1, kind: input, shape index: {}]   ;;  %s1458_s2 = inlined_call_operand.vmem [shape: f32[1,128], index: 2, kind: input, shape index: {}]   ;;  %s1459_s3 = inlined_call_operand.vmem [shape: bf16[128,128], index: 3, kind: input, shape index: {}]   ;;  %s1460_s4 = inlined_call_operand.vmem [shape: f32[1,128], index: 4, kind: input, shape index: {}]   ;;  %s1461_s5 = inlined_call_operand.vmem [shape: bf16[128,128], index: 5, kind: input, shape index: {}]   ;;  %s1462_s6 = inlined_call_operand.vmem [shape: f32[1,128], index: 6, kind: input, shape index: {}]   ;;  %s1463_s7 = inlined_call_operand.hbm [shape: f32[2,1,128], index: 7, kind: output, shape index: {}]  }
   0x1   :  { %14 = vsyncpa [#allocation3 + $0x1], 0  ;;  %s1197_s24 = smov 0   ;;  %s1199_s25 = smov 0  }
   0x2   :  { %s1201_s26 = smov 0   ;;  %s1203_s27 = smov 0  }
   0x3 LB: > { %s1218_s28 = sadd.s32 4294967295, %s1150_s27   ;;  %s871_s29 = sadd.s32 4294967294, %s1150_s27   ;;  %s1150_s27 = sphi %s1203_s27, %s1469_s27   ;;  %s1146_s26 = sphi %s1201_s26, %s1468_s26   ;;  %s1142_s25 = sphi %s1199_s25, %s1467_s25   ;;  %s1138_s24 = sphi %s1197_s24, %s1466_s24  }
   0x4   : > { %s1222_s30 = sadd.s32 1, %s1150_s27   ;;  %s179_s8 = sadd.s32 1, %s1146_s26 }
   0x5   : > { %s176_s9 = ssub.s32 %s1150_s27, %s1222_s30  ;;  %p189_p0 = scmp.ne.s32.totalorder %s1146_s26, %s1142_s25 }
   0x6   : > { %p177_p1 = scmp.eq.s32.totalorder %s176_s9, 0  ;;  %p190_p2 = scmp.eq.s32.totalorder %s1218_s28, 1 }
   0x7   : > { %p195_p3 = scmp.ne.s32.totalorder %s1142_s25, %s1138_s24  ;;  %p196_p4 = scmp.eq.s32.totalorder %s871_s29, 1 }
   0x8   : > { %s1233_s10 = scalar_select %p177_p1, %s1146_s26, %s179_s8  }
   0x9   : > { %p1235_p5 = por %p190_p2, %p189_p0  ;;  %p1239_p6 = por %p196_p4, %p195_p3 }
   0xa   : > { %p874_p7 = scmp.ge.s32.totalorder %s1150_s27, 1  ;;  %p239_p8 = scmp.lt.s32.totalorder %s1150_s27, 3 }
   0xc   : > { %p240_p9 = pnand %p874_p7, %p239_p8 }
   0xd   : > { %p269_p10 = scmp.lt.s32.totalorder (!%p240_p9), %s1218_s28, 1  ;;  %s919_s23 = sshll.u32 (!%p240_p9), %s1218_s28, 4 }
   0xe   : > { %243 = sbr.rel (%p240_p9) target bundleno = 690 (0x2b2), region = 48  ;;  %s1415_s14 = scalar_lea.hbm (!%p240_p9), %s1463_s7, %s919_s23 }
  0x13   : > { %v1045_v0 = vld [vmem:[%s1457_s1 + $0x78] sm:$0xff]   ;;  %v1152_v1 = vmov 0   ;;  %v1048_v4 = vld [vmem:[%s1457_s1 + $0x70] sm:$0xff]   ;;  %v1051_v7 = vld [vmem:[%s1457_s1 + $0x68] sm:$0xff]   ;;  %s270_s8 = scalar_select %p269_p10, %s1218_s28, 1  ;;  %v338_v20 = vlaneseq  ;;  %vm504_vm0 = vcmask 130048  }
  0x14   : > { %548 = vmatprep.subr.bf16.mxu1 %v1152_v1  ;;  %v1046_v2 = vld [vmem:[%s1457_s1 + $0xb8] sm:$0xff]   ;;  %922 = vmatprep.subr.bf16.mxu0 %v1045_v0  ;;  %v1049_v5 = vld [vmem:[%s1457_s1 + $0xb0] sm:$0xff]   ;;  %v1052_v8 = vld [vmem:[%s1457_s1 + $0xa8] sm:$0xff]   ;;  %v1153_v25 = vmov 1966171168   ;;  %v1154_v38 = vmov 0.0  }
  0x15   : > { %v1047_v3 = vld [vmem:[%s1457_s1 + $0x38] sm:$0xff]   ;;  %549 = vmatpush1.bf16.msra.mxu1 %v1046_v2  ;;  %v1050_v6 = vld [vmem:[%s1457_s1 + $0x30] sm:$0xff]   ;;  %v1053_v9 = vld [vmem:[%s1457_s1 + $0x28] sm:$0xff]   ;;  %s875_s18 = sshll.u32 %s270_s8, 2  ;;  %v336_v26 = vunpack.c.l.s4 %v1153_v25  ;;  %v339_v27 = vshrl.u32 %v338_v20, 7  ;;  %vm1155_vm1 = vmmov 0  }
  0x16   : > { %923 = vmatpush3.bf16.msra.mxu0 %v1047_v3  ;;  %550 = vmatprep.subr.bf16.mxu1 %v1152_v1  ;;  %v1054_v10 = vld [vmem:[%s1457_s1 + $0x60] sm:$0xff]   ;;  %v1057_v13 = vld [vmem:[%s1457_s1 + $0x58] sm:$0xff]   ;;  %v1060_v16 = vld [vmem:[%s1457_s1 + $0x50] sm:$0xff]   ;;  %s272_s8 = scalar_lea.vmem %s1456_s0, %s875_s18  ;;  %s267_s18 = sand.u32 1, %s1142_s25  }
  0x17   : > { %924 = vmatprep.subr.bf16.mxu0 %v1048_v4  ;;  %v1055_v11 = vld [vmem:[%s1457_s1 + $0xa0] sm:$0xff]   ;;  %v1058_v14 = vld [vmem:[%s1457_s1 + $0x98] sm:$0xff]   ;;  %v1061_v17 = vld [vmem:[%s1457_s1 + $0x90] sm:$0xff]   ;;  %v337_v31 = vunpack.c.0.s8 %v336_v26  ;;  %s268_s29 = scalar_lea.vmem [#allocation2], %s267_s18  ;;  %s804_s15 = scalar_lea.sflag [#allocation3], %s267_s18 }
  0x18   : > { %v1056_v12 = vld [vmem:[%s1457_s1 + $0x20] sm:$0xff]   ;;  %v1059_v15 = vld [vmem:[%s1457_s1 + $0x18] sm:$0xff]   ;;  %v1062_v18 = vld [vmem:[%s1457_s1 + $0x10] sm:$0xff]   ;;  %s816_s9 = sshll.u32 %s268_s29, 4  ;;  %s1156_s28 = smov [#allocation2]   ;;  %s1417_s9 = int_to_ptr.vmem [resolvable:$true] %s816_s9 }
  0x19   : > { %551 = vmatpush1.bf16.msra.mxu1 %v1049_v5  ;;  %v1063_v19 = vld [vmem:[%s1457_s1 + $0x48] sm:$0xff]   ;;  %v876_v23 = vld.sshfl [vmem:[%s272_s8] sm:$0x33 pattern:$0x75316420]  ;;  %v340_v32 = vsub.s32 %v337_v31, %v339_v27  ;;  %v1070_v34 = vld [vmem:[%s1459_s3 + $0x38] sm:$0xff]  }
  0x1a   : > { %925 = vmatpush3.bf16.msra.mxu0 %v1050_v6  ;;  %552 = vmatprep.subr.bf16.mxu1 %v1152_v1  ;;  %v1064_v21 = vld [vmem:[%s1457_s1 + $0x88] sm:$0xff]   ;;  %v1066_v24 = vld [vmem:[%s1457_s1 + $0x40] sm:$0xff]   ;;  %v334_v30 = vcombine.high %v876_v23, %v876_v23  ;;  %v1071_v40 = vld [vmem:[%s1459_s3 + $0x30] sm:$0xff]   ;;  %s1090_s16 = scalar_lea.vmem %s1417_s9, 16  ;;  %s1094_s17 = sshll.u32 %s1156_s28, 4  ;;  %s1095_s17 = int_to_ptr.vmem [resolvable:$false] %s1094_s17 }
  0x1b   : > { %926 = vmatprep.subr.bf16.mxu0 %v1051_v7  ;;  %v1065_v22 = vld [vmem:[%s1457_s1 + $0x8] sm:$0xff]   ;;  %v1067_v28 = vld [vmem:[%s1457_s1 + $0x80] sm:$0xff]   ;;  %v341_v36 = vrot.slane %v876_v23, %v340_v32  ;;  %v1074_v43 = vld [vmem:[%s1459_s3 + $0x18] sm:$0xff]   ;;  %p1091_p11 = scmp.ne.s32.totalorder %s1417_s9, %s1090_s16  ;;  %s1096_s19 = scalar_lea.vmem %s1095_s17, 32 }
  0x1c   : > { %v1068_v29 = vld [vmem:[%s1457_s1] sm:$0xff]   ;;  %v348_v35 = vrot.slane %v334_v30, %v340_v32  ;;  %v1072_v41 = vld [vmem:[%s1459_s3 + $0x28] sm:$0xff]   ;;  %v1075_v44 = vld [vmem:[%s1459_s3 + $0x10] sm:$0xff]   ;;  %p1097_p0 = scmp.lt.s32.totalorder %s1417_s9, %s1095_s17  ;;  %p1098_p1 = scmp.lt.s32.totalorder %s1096_s19, %s1090_s16 }
  0x1d   : > { %553 = vmatpush1.bf16.msra.mxu1 %v1052_v8  ;;  %v1069_v33 = vld [vmem:[%s1457_s1 + $0xc0] sm:$0xff]   ;;  %v349_v39 = vcombine.high %v341_v36, %v341_v36  ;;  %v1076_v45 = vld [vmem:[%s1459_s3 + $0x8] sm:$0xff]   ;;  %v1078_v47 = vld [vmem:[%s1461_s5 + $0x38] sm:$0xff]   ;;  %p1092_p12 = pnand %p1091_p11, %p1235_p5 }
  0x1e   : > { %927 = vmatpush3.bf16.msra.mxu0 %v1053_v9  ;;  %554 = vmatprep.subr.bf16.mxu1 %v1152_v1  ;;  %v350_v37 = vcombine.high %v348_v35, %v348_v35  ;;  %v1073_v42 = vld [vmem:[%s1459_s3 + $0x20] sm:$0xff]   ;;  %v1079_v48 = vld [vmem:[%s1461_s5 + $0x30] sm:$0xff]   ;;  %v1080_v49 = vld [vmem:[%s1461_s5 + $0x28] sm:$0xff]   ;;  %p1099_p2 = por %p1098_p1, %p1097_p0 }
  0x1f   : > { %928 = vmatprep.subr.bf16.mxu0 %v1054_v10  ;;  %540 = vmatprep.mubr.bf16.mxu0 %v348_v35  ;;  %v1077_v46 = vld [vmem:[%s1459_s3] sm:$0xff]   ;;  %v1083_v2 = vld [vmem:[%s1461_s5 + $0x10] sm:$0xff]   ;;  %v1084_v3 = vld [vmem:[%s1461_s5 + $0x8] sm:$0xff]   ;;  %p1093_p13 = pneg %p1092_p12 }
  0x20   : > { %902 = vmatprep.mubr.msk.bf16.mxu1 %vm504_vm0, %v350_v37  ;;  %v325_v52 = vld [vmem:[%s1458_s2] sm:$0x1] }
  0x21   : > { %555 = vmatpush1.bf16.msra.mxu1 %v1055_v11  ;;  %v1081_v0 = vld [vmem:[%s1461_s5 + $0x20] sm:$0xff]   ;;  %p1100_p3 = pnand %p1099_p2, %p1093_p13 }
  0x22   : > { %929 = vmatpush3.bf16.msra.mxu0 %v1056_v12  ;;  %556 = vmatprep.subr.bf16.mxu1 %v1152_v1  ;;  %v1085_v4 = vld [vmem:[%s1461_s5] sm:$0xff]  }
  0x23   : > { %930 = vmatprep.subr.bf16.mxu0 %v1057_v13  ;;  %v606_v5 = vld [vmem:[%s1460_s4] sm:$0x1] }
  0x24   : > { %v713_v13 = vld [vmem:[%s1462_s6] sm:$0x1] }
  0x25   : > { %557 = vmatpush1.bf16.msra.mxu1 %v1058_v14 }
  0x26   : > { %931 = vmatpush3.bf16.msra.mxu0 %v1059_v15  ;;  %558 = vmatprep.subr.bf16.mxu1 %v1152_v1 }
  0x27   : > { %932 = vmatprep.subr.bf16.mxu0 %v1060_v16 }
  0x29   : > { %559 = vmatpush1.bf16.msra.mxu1 %v1061_v17 }
  0x2a   : > { %933 = vmatpush3.bf16.msra.mxu0 %v1062_v18  ;;  %560 = vmatprep.subr.bf16.mxu1 %v1152_v1 }
  0x2b   : > { %934 = vmatprep.subr.bf16.mxu0 %v1063_v19 }
  0x2d   : > { %561 = vmatpush1.bf16.msra.mxu1 %v1064_v21 }
  0x2e   : > { %935 = vmatpush3.bf16.msra.mxu0 %v1065_v22  ;;  %562 = vmatprep.subr.bf16.mxu1 %v1152_v1 }
  0x2f   : > { %936 = vmatprep.subr.bf16.mxu0 %v1066_v24 }
  0x31   : > { %563 = vmatpush1.bf16.msra.mxu1 %v1067_v28 }
  0x32   : > { %937 = vmatpush3.bf16.msra.mxu0 %v1068_v29  ;;  %578 = vmatprep.subr.bf16.mxu1 %v1152_v1  ;;  %v1082_v1 = vld [vmem:[%s1461_s5 + $0x18] sm:$0xff]  }
  0x33   : > { %962 = vmatprep.subr.bf16.mxu0 %v1154_v38 }
  0x35   : > { %541 = vmatmul.mubr.bf16.vlgmr.msra.gmra.mxu0 %v341_v36  ;;  %579 = vmatpush2.bf16.msra.mxu1 %v1069_v33 }
  0x36   : > { %963 = vmatpush3.bf16.msra.mxu0 %v1070_v34  ;;  %982 = vmatprep.subr.bf16.mxu1 %v1154_v38 }
  0x37   : > { %964 = vmatprep.subr.bf16.mxu0 %v1154_v38  ;;  %978 = vmatprep.mubr.msk.bf16.mxu0 %vm1155_vm1, %v1154_v38 }
  0x38   : > { %581 = vmatmul.mubr.bf16.vlgmr.msra.gmra.mxu1 %v349_v39 }
  0x39   : > { %998 = vmatprep.mubr.msk.bf16.mxu1 %vm1155_vm1, %v1154_v38  ;;  %983 = vmatpush3.bf16.msra.mxu1 %v1078_v47 }
  0x3a   : > { %965 = vmatpush3.bf16.msra.mxu0 %v1071_v40  ;;  %984 = vmatprep.subr.bf16.mxu1 %v1154_v38 }
  0x3b   : > { %966 = vmatprep.subr.bf16.mxu0 %v1154_v38 }
  0x3d   : > { %985 = vmatpush3.bf16.msra.mxu1 %v1079_v48 }
  0x3e   : > { %967 = vmatpush3.bf16.msra.mxu0 %v1072_v41  ;;  %986 = vmatprep.subr.bf16.mxu1 %v1154_v38 }
  0x3f   : > { %968 = vmatprep.subr.bf16.mxu0 %v1154_v38 }
  0x41   : > { %987 = vmatpush3.bf16.msra.mxu1 %v1080_v49 }
  0x42   : > { %969 = vmatpush3.bf16.msra.mxu0 %v1073_v42  ;;  %988 = vmatprep.subr.bf16.mxu1 %v1154_v38 }
  0x43   : > { %970 = vmatprep.subr.bf16.mxu0 %v1154_v38 }
  0x45   : > { %989 = vmatpush3.bf16.msra.mxu1 %v1081_v0 }
  0x46   : > { %971 = vmatpush3.bf16.msra.mxu0 %v1074_v43  ;;  %990 = vmatprep.subr.bf16.mxu1 %v1154_v38 }
  0x47   : > { %972 = vmatprep.subr.bf16.mxu0 %v1154_v38 }
  0x49   : > { %991 = vmatpush3.bf16.msra.mxu1 %v1082_v1 }
  0x4a   : > { %973 = vmatpush3.bf16.msra.mxu0 %v1075_v44  ;;  %992 = vmatprep.subr.bf16.mxu1 %v1154_v38 }
  0x4b   : > { %974 = vmatprep.subr.bf16.mxu0 %v1154_v38 }
  0x4d   : > { %993 = vmatpush3.bf16.msra.mxu1 %v1083_v2 }
  0x4e   : > { %975 = vmatpush3.bf16.msra.mxu0 %v1076_v45  ;;  %994 = vmatprep.subr.bf16.mxu1 %v1154_v38 }
  0x4f   : > { %976 = vmatprep.subr.bf16.mxu0 %v1154_v38 }
  0x51   : > { %995 = vmatpush3.bf16.msra.mxu1 %v1084_v3 }
  0x52   : > { %977 = vmatpush3.bf16.msra.mxu0 %v1077_v46  ;;  %996 = vmatprep.subr.bf16.mxu1 %v1154_v38 }
  0x55   : > { %997 = vmatpush3.bf16.msra.mxu1 %v1085_v4 }
  0xf5   : > { %v938_v50 = vpop.f32.mrf.mxu0 }
  0xf7   : > { %v939_v51 = vpop.f32.mrf.mxu0 }
  0xf8   : > { %v940_v53 = vadd.f32 %v939_v51, %v938_v50  ;;  %v582_v54 = vpop.f32.mrf.mxu1 }
  0xf9   : > { %v941_v55 = vpop.f32.mrf.mxu0 }
  0xfa   : > { %v543_v56 = vadd.f32 %v940_v53, %v325_v52  ;;  %v584_v57 = vpop.f32.mrf.mxu1 }
  0xfb   : > { %v942_v58 = vpop.f32.mrf.mxu0 }
  0xfc   : > { %v583_v59 = vadd.f32 %v582_v54, %v543_v56  ;;  %v585_v60 = vpop.f32.mrf.mxu1 }
  0xfe   : > { %1086 = vtanh.f32 %v583_v59  ;;  %v586_v61 = vpop.f32.mrf.mxu1 }
 0x10b   : > { %v1087_v62 = vpop.eup %1086 }
 0x10c   : > { %v589_v63 = vpack.c.bf16 %v1087_v62, %v1087_v62 }
 0x10e   : > { %979 = vmatmul.mubr.bf16.vlgmr.msra.gmra.mxu0 %v589_v63 }
 0x1ce   : > { %v689_v6 = vpop.f32.mrf.mxu0 }
 0x1cf   : > { %v690_v7 = vadd.f32 %v689_v6, %v606_v5 }
 0x1d0   : > { %v980_v8 = vpop.f32.mrf.mxu0 }
 0x1d1   : > { %1088 = vtanh.f32 %v690_v7 }
 0x1d2   : > { %v692_v9 = vpop.f32.mrf.mxu0 }
 0x1d4   : > { %v981_v10 = vpop.f32.mrf.mxu0 }
 0x1de   : > { %v1089_v11 = vpop.eup %1088 }
 0x1df   : > { %v696_v12 = vpack.c.bf16 %v1089_v11, %v1089_v11 }
 0x1e1   : > { %999 = vmatmul.mubr.bf16.vlgmr.msra.gmra.mxu1 %v696_v12 }
 0x2a1   : > { %v796_v14 = vpop.f32.mrf.mxu1 }
 0x2a2   : > { %v797_v15 = vadd.f32 %v796_v14, %v713_v13 }
 0x2a3   : > { %v1000_v16 = vpop.f32.mrf.mxu1 }
 0x2a4   : > { %802 = vst [vmem:[%s268_s29] sm:$0x1] %v797_v15 }
 0x2a5   : > { %v799_v17 = vpop.f32.mrf.mxu1 }
 0x2a6   : > { %1103 = shalt.err (!%p1100_p3)
}
 0x2a7   : > { %s1104_s20 = scalar_lea.hbm %s1415_s14, 16  ;;  %s1108_s22 = scalar_lea.hbm %s1463_s7, 32 }
 0x2a8   : > { %p1105_p4 = scmp.ne.s32.totalorder %s1415_s14, %s1104_s20  ;;  %p1109_p9 = scmp.lt.s32.totalorder %s1415_s14, %s1463_s7 }
 0x2a9   : > { %p1110_p10 = scmp.lt.s32.totalorder %s1108_s22, %s1104_s20 }
 0x2aa   : > { %p1106_p7 = pnand %p1105_p4, %p1235_p5 }
 0x2ab   : > { %p1111_p11 = por %p1110_p10, %p1109_p9 }
 0x2ac   : > { %p1107_p8 = pneg %p1106_p7 }
 0x2ae   : > { %p1112_p12 = pnand %p1111_p11, %p1107_p8 }
 0x2b0   : > { %1115 = shalt.err (!%p1112_p12)
}
 0x2b1   : > { %1002 = dma.vmem_to_hbm [thread:$0]  (%p1235_p5), %s1417_s9, 16, %s1415_s14, %s804_s15   ;;  %v1001_v18 = vpop.f32.mrf.mxu1 }
 0x2b2 PF: > { %p1008_p13 = scmp.ge.s32.totalorder %s1150_s27, 2  ;;  %s828_s13 = sand.u32 1, %s1138_s24  }
 0x2b3   : > { %s829_s8 = scalar_lea.sflag [#allocation3], %s828_s13 }
 0x2b4   : > { %p1005_p0 = pnand %p1008_p13, %p1239_p6 }
 0x2b6   : > { %p1006_p1 = pneg %p1005_p0 }
 0x2b8   : > { %1133 = dma.done.wait (%p1006_p1), %s829_s8, 16  }
 0x2b9   : > { %1135 = vsyncadd (%p1006_p1), %s829_s8, 4294967280  ;;  %p17_p2 = scmp.ge.s32.totalorder %s1222_s30, 4   ;;  %s1466_s24 = smov %s1142_s25 }
 0x2ba   : > { %s1467_s25 = smov %s1146_s26  ;;  %s1468_s26 = smov %s1233_s10 }
 0x2bb   : > { %s1469_s27 = smov %s1222_s30  ;;  %19 = sbr.rel (!%p17_p2) target bundleno = 3 (0x3), region = 83 }
 0x2c0   :  { %833 = vsyncpa [#allocation3], 1 }
 0x2c1   :  { %835 = vsyncpa [#allocation3 + $0x1], 1 }

</bundles_post_ra>
